<compile_context>
chip_gen: v6e
topology: v6e:2x2x1
jax: 0.10.0
libtpu: 0.0.40
codegen_flags: <defaults>
</compile_context>

<pallas_src>
import jax
import jax.numpy as jnp
from jax import lax
from jax.experimental import pallas as pl
from jax.experimental.pallas import tpu as pltpu


# ----------------------------------------------------------------------------
# Fused Pallas kernel: one grid step == one full PointerNetwork forward
# (training branch) over the whole batch, T iterations statically unrolled.
# ----------------------------------------------------------------------------
def _fused_pointer_kernel(
    gold_ref,    # SMEM (2, T*B) i32  scalar-prefetch gold indices, [n, t*B + b]
    sib0_ref,    # (1, B, D)    f32   initial sibling for this network
    emb_ref,     # (B, L, D)    f32   all_embeddings (shared by both networks)
    mask_ref,    # (B, L)       f32   all_masks (1 = valid, shared)
    pw3_ref,     # (1, B, D, D) f32   pw3[b,k,j] = sum_i parent[b,i] * Wbil[k,i,j]
    attw_ref,    # (1, 2D, D)   f32   rows [0:D]=Wq, [D:2D]=Wk
    gruw_ref,    # (1, 2D, 3D)  f32   rows [0:D]=W_ih^T, [D:2D]=W_hh^T
    bias_ref,    # (1, 5, 3D)   f32   rows: bilinear_b | attn_b | attn_v | b_ih | b_hh
    out_ref,     # (1, B, T)    f32   gold-target probability per iteration
):
    n = pl.program_id(0)
    B, L, D = emb_ref.shape
    T = out_ref.shape[2]

    # ---- loads / unpacking (once per grid step) ----
    emb = emb_ref[...]                                  # (B, L, D)
    mask_valid = mask_ref[...] > 0.5                    # (B, L) bool
    pw3 = pw3_ref[0]                                    # (B, D, D)
    attw = attw_ref[0]
    wq, wk = attw[:D, :], attw[D:, :]                   # (D, D) each
    gruw = gruw_ref[0]
    wih, whh = gruw[:D, :], gruw[D:, :]                 # (D, 3D) each
    bias = bias_ref[0]                                  # (5, 3D)
    bbil = bias[0:1, :D]                                # (1, D)
    batt = bias[1:2, :D]                                # (1, D)
    vatt = bias[2:3, :D]                                # (1, D)
    bih = bias[3:4, :]                                  # (1, 3D)
    bhh = bias[4:5, :]                                  # (1, 3D)

    # ---- iteration-invariant work (hoisted out of the pointer loop) ----
    # attention keys: one clean 2-D MXU matmul per batch row (no broadcast of Wk)
    keys = jnp.concatenate(
        [jnp.dot(emb[b], wk, preferred_element_type=jnp.float32)[None]
         for b in range(B)],
        axis=0)                                          # (B, L, D)

    iota_l = lax.broadcasted_iota(jnp.int32, (1, L), 1)  # (1, L)
    neg_inf = jnp.float32(-1e30)

    sibling = sib0_ref[0]                                # (B, D)
    cols = []
    for t in range(T):                                   # static unroll (T is small)
        # ---- nn.Bilinear(parent, sibling): parent already folded into pw3 ----
        query = jnp.sum(pw3 * sibling[:, None, :], axis=-1) + bbil          # (B, D)

        # ---- TanhAttention(query, all_embeddings, all_masks) ----
        qp = jnp.dot(query, wq, preferred_element_type=jnp.float32) + batt  # (B, D)
        e = jnp.tanh(qp[:, None, :] + keys)                                 # (B, L, D)
        logits = jnp.sum(e * vatt[None], axis=-1)                           # (B, L)
        logits = jnp.where(mask_valid, logits, neg_inf)

        # ---- softmax over L (only gold entry is needed) ----
        m = jnp.max(logits, axis=-1, keepdims=True)
        p = jnp.exp(logits - m)                                             # (B, L)
        inv = pl.reciprocal(jnp.sum(p, axis=-1, keepdims=True), approx=True)  # (B, 1)

        # ---- training branch: gather gold-target prob / embedding (SMEM idx) ----
        sel_rows, tp_rows = [], []
        for b in range(B):                               # static unroll (B is small)
            idx = gold_ref[n, t * B + b]                 # scalar i32 from SMEM
            sel_rows.append(emb_ref[b, pl.ds(idx, 1), :])                   # (1, D)
            tp_rows.append(jnp.where(iota_l == idx, p[b:b + 1, :], 0.0))    # (1, L)
        selected = jnp.concatenate(sel_rows, axis=0)                        # (B, D)
        tp = jnp.sum(jnp.concatenate(tp_rows, axis=0),
                     axis=-1, keepdims=True) * inv                          # (B, 1)
        cols.append(tp)

        # ---- nn.GRUCell(selected, sibling) ----
        gi = jnp.dot(selected, wih, preferred_element_type=jnp.float32) + bih  # (B, 3D)
        gh = jnp.dot(sibling, whh, preferred_element_type=jnp.float32) + bhh   # (B, 3D)
        r = jax.nn.sigmoid(gi[:, :D] + gh[:, :D])
        z = jax.nn.sigmoid(gi[:, D:2 * D] + gh[:, D:2 * D])
        ng = jnp.tanh(gi[:, 2 * D:] + r * gh[:, 2 * D:])
        sibling = (1.0 - z) * ng + z * sibling

    # single dense store at the end (instead of T tiny masked stores)
    out_ref[0] = jnp.concatenate(cols, axis=-1)                             # (B, T)


# ----------------------------------------------------------------------------
# Python wrappers: parameter packing + pallas_call plumbing
# ----------------------------------------------------------------------------
def _prep_network(p, parent):
    """Fold parent into the bilinear weight and pack small params."""
    D = parent.shape[-1]
    f32 = jnp.float32
    # pw3[b, k, j] = sum_i parent[b, i] * W[k, i, j]  (iteration-invariant)
    pw3 = jnp.einsum('bi,kij->bkj', parent.astype(f32),
                     p['bilinear_w'].astype(f32))                     # (B, D, D)
    attw = jnp.concatenate([p['attn_wq'], p['attn_wk']], axis=0).astype(f32)      # (2D, D)
    gruw = jnp.concatenate([p['gru_w_ih'].T, p['gru_w_hh'].T], axis=0).astype(f32)  # (2D, 3D)

    def row(v):
        v = v.astype(f32)
        return jnp.pad(v, (0, 3 * D - v.shape[0]))
    biases = jnp.stack([row(p['bilinear_b']), row(p['attn_b']), row(p['attn_v']),
                        row(p['gru_b_ih']), row(p['gru_b_hh'])], axis=0)  # (5, 3D)
    return pw3, attw, gruw, biases


def fused_pointer_networks(params_a, params_b, parent, sibling_a, sibling_b,
                           all_embeddings, all_masks, gold_a, gold_b):
    """Run two PointerNetwork.forward (training mode) in one fused pallas_call.

    Returns (probs_a, probs_b) with shapes (B, T_a) and (B, T_b), matching
    torch.stack(results, dim=1) of each network.
    """
    B, L, D = all_embeddings.shape
    Ta, Tb = gold_a.shape[1], gold_b.shape[1]
    T = max(Ta, Tb)

    def pad_gold(g):
        g = jnp.clip(g.astype(jnp.int32), 0, L - 1)
        g = jnp.pad(g, ((0, 0), (0, T - g.shape[1])))     # (B, T)
        return g.T.reshape(T * B)                         # flat [t*B + b]

    gold = jnp.stack([pad_gold(gold_a), pad_gold(gold_b)], axis=0)  # (2, T*B) i32

    prep_a = _prep_network(params_a, parent)
    prep_b = _prep_network(params_b, parent)
    pw3 = jnp.stack([prep_a[0], prep_b[0]], axis=0)       # (2, B, D, D)
    attw = jnp.stack([prep_a[1], prep_b[1]], axis=0)      # (2, 2D, D)
    gruw = jnp.stack([prep_a[2], prep_b[2]], axis=0)      # (2, 2D, 3D)
    biases = jnp.stack([prep_a[3], prep_b[3]], axis=0)    # (2, 5, 3D)
    sib0 = jnp.stack([sibling_a, sibling_b], axis=0).astype(jnp.float32)  # (2, B, D)

    emb = all_embeddings.astype(jnp.float32)
    mask = all_masks.astype(jnp.float32)

    grid_spec = pltpu.PrefetchScalarGridSpec(
        num_scalar_prefetch=1,                            # gold -> SMEM
        grid=(2,),                                        # one step per network
        in_specs=[
            pl.BlockSpec((1, B, D), lambda n, g: (n, 0, 0)),         # sib0
            pl.BlockSpec((B, L, D), lambda n, g: (0, 0, 0)),         # emb (shared)
            pl.BlockSpec((B, L), lambda n, g: (0, 0)),               # mask (shared)
            pl.BlockSpec((1, B, D, D), lambda n, g: (n, 0, 0, 0)),   # pw3
            pl.BlockSpec((1, 2 * D, D), lambda n, g: (n, 0, 0)),     # [Wq;Wk]
            pl.BlockSpec((1, 2 * D, 3 * D), lambda n, g: (n, 0, 0)), # [Wih^T;Whh^T]
            pl.BlockSpec((1, 5, 3 * D), lambda n, g: (n, 0, 0)),     # bias slab
        ],
        out_specs=pl.BlockSpec((1, B, T), lambda n, g: (n, 0, 0)),
    )

    out = pl.pallas_call(
        _fused_pointer_kernel,
        out_shape=jax.ShapeDtypeStruct((2, B, T), jnp.float32),
        grid_spec=grid_spec,
        compiler_params=pltpu.CompilerParams(
            dimension_semantics=("parallel",)),           # 2 TCs on v7x
    )(gold, sib0, emb, mask, pw3, attw, gruw, biases)

    return out[0, :, :Ta], out[1, :, :Tb]


def init_pointer_network_params(key, dim):
    ks = jax.random.split(key, 8)
    s = 0.1
    return {
        'bilinear_w': jax.random.normal(ks[0], (dim, dim, dim), jnp.float32) * s,
        'bilinear_b': jax.random.normal(ks[1], (dim,), jnp.float32) * s,
        'attn_wq': jax.random.normal(ks[2], (dim, dim), jnp.float32) * s,
        'attn_wk': jax.random.normal(ks[3], (dim, dim), jnp.float32) * s,
        'attn_b': jax.random.normal(ks[4], (dim,), jnp.float32) * s,
        'attn_v': jax.random.normal(ks[5], (dim,), jnp.float32) * s,
        'gru_w_ih': jax.random.normal(ks[6], (3 * dim, dim), jnp.float32) * s,
        'gru_w_hh': jax.random.normal(ks[7], (3 * dim, dim), jnp.float32) * s,
        'gru_b_ih': jnp.zeros((3 * dim,), jnp.float32),
        'gru_b_hh': jnp.zeros((3 * dim,), jnp.float32),
    }


def init_one_stage_params(key, dim):
    ks = jax.random.split(key, 6)
    return {
        'claim_ext': init_pointer_network_params(ks[0], dim),
        'premise_ext': init_pointer_network_params(ks[1], dim),
        'global2claim': init_pointer_network_params(ks[2], dim),
        'claim2premise': init_pointer_network_params(ks[3], dim),
        'query_claim': jax.random.normal(ks[4], (1, 1, dim), jnp.float32),
        'query_premise': jax.random.normal(ks[5], (1, 1, dim), jnp.float32),
    }


def one_stage_pointer_reasoning_forward(params, sentence_feat, sentence_mask,
                                        gold_claim=None, gold_premise=None):
    """Mirror of OneStagePointerReasoning.forward (reference body is truncated)."""
    B, _, D = sentence_feat.shape
    L = sentence_mask.shape[1]

    global_feat = sentence_feat[:, 0]                         # (B, D)  <CLS>
    gold_claim_head = gold_claim[:, :, 0]                     # (B, N_claim)
    gold_premise_head = gold_premise[:, :, 0]                 # (B, N_premise)
    # Reference uses the undefined `self.initial_sub`; query_claim is the
    # corresponding parameter.
    initial_claim = jnp.repeat(params['query_claim'], B, axis=0)      # (B, 1, D)
    initial_premise = jnp.repeat(params['query_premise'], B, axis=0)  # (B, 1, D)

    # TODO(synk): reference forward ends with `pass` (returns None); below we
    # run the PointerNetwork hot path (bilinear + tanh-attention + softmax +
    # GRU memory update) inside one fused Pallas kernel on the prepared tensors.
    sent_tokens = sentence_feat[:, 1:1 + L]                   # (B, L, D)
    claim_probs, premise_probs = fused_pointer_networks(
        params['global2claim'], params['claim2premise'],
        global_feat,
        initial_claim[:, 0], initial_premise[:, 0],
        sent_tokens, sentence_mask,
        gold_claim_head, gold_premise_head)

    return {
        'global_feat': global_feat,
        'initial_claim': initial_claim,
        'initial_premise': initial_premise,
        'claim_pointer_probs': claim_probs,                   # (B, N_claim)
        'premise_pointer_probs': premise_probs,               # (B, N_premise)
    }


if __name__ == "__main__":
    key = jax.random.PRNGKey(0)
    D = 32          # dim
    B = 2           # batch
    L = 8           # number of sentences
    MAX_CLAIM_NUM = 3
    MAX_PREMISE_NUM = 3
    MAX_CLAIM_LEN = 4
    MAX_PREMISE_LEN = 4

    k_p, k_x, k_gc, k_gp = jax.random.split(key, 4)
    params = init_one_stage_params(k_p, D)

    sentence_feat = jax.random.normal(k_x, (B, L + 2, D), jnp.float32)   # <CLS> + L + <EOP>
    sentence_mask = jnp.ones((B, L), jnp.float32)
    gold_claim = jax.random.randint(k_gc, (B, MAX_CLAIM_NUM, MAX_CLAIM_LEN), 0, L)
    gold_premise = jax.random.randint(k_gp, (B, MAX_PREMISE_NUM, MAX_PREMISE_LEN), 0, L)

    out = one_stage_pointer_reasoning_forward(
        params, sentence_feat, sentence_mask, gold_claim, gold_premise)
    jax.tree_util.tree_map(jax.block_until_ready, out)
    print("KERNEL_OK")
</pallas_src>

<mosaic_0001>
module attributes {stable_mosaic.version = 11 : i64} {
  func.func @_fused_pointer_kernel(%arg0: i32, %arg1: memref<2x6xi32, #tpu.memory_space<smem>>, %arg2: memref<1x2x32xf32, #tpu.memory_space<vmem>>, %arg3: memref<2x8x32xf32, #tpu.memory_space<vmem>>, %arg4: memref<2x8xf32, #tpu.memory_space<vmem>>, %arg5: memref<1x2x32x32xf32, #tpu.memory_space<vmem>>, %arg6: memref<1x64x32xf32, #tpu.memory_space<vmem>>, %arg7: memref<1x64x96xf32, #tpu.memory_space<vmem>>, %arg8: memref<1x5x96xf32, #tpu.memory_space<vmem>>, %arg9: memref<1x2x3xf32, #tpu.memory_space<vmem>>) attributes {dimension_semantics = [#tpu.dimension_semantics<parallel>], iteration_bounds = array<i64: 2>, scalar_prefetch = 1 : i64, scratch_operands = 0 : i64, tpu.core_type = #tpu.core_type<tc>, window_params = [{transform_indices = @transform_0, window_bounds = array<i64: 1, 2, 32>}, {pipeline_mode = #tpu.pipeline_mode<synchronous>, transform_indices = @transform_1, window_bounds = array<i64: 2, 8, 32>}, {pipeline_mode = #tpu.pipeline_mode<synchronous>, transform_indices = @transform_2, window_bounds = array<i64: 2, 8>}, {transform_indices = @transform_3, window_bounds = array<i64: 1, 2, 32, 32>}, {transform_indices = @transform_4, window_bounds = array<i64: 1, 64, 32>}, {transform_indices = @transform_5, window_bounds = array<i64: 1, 64, 96>}, {transform_indices = @transform_6, window_bounds = array<i64: 1, 5, 96>}, {transform_indices = @transform_7, window_bounds = array<i64: 1, 2, 3>}]} {
    %c0 = arith.constant 0 : index
    %c0_0 = arith.constant 0 : index
    %c0_1 = arith.constant 0 : index
    %0 = vector.load %arg3[%c0, %c0_0, %c0_1] : memref<2x8x32xf32, #tpu.memory_space<vmem>>, vector<2x8x32xf32>
    %c0_2 = arith.constant 0 : index
    %c0_3 = arith.constant 0 : index
    %1 = vector.load %arg4[%c0_2, %c0_3] : memref<2x8xf32, #tpu.memory_space<vmem>>, vector<2x8xf32>
    %cst = arith.constant 5.000000e-01 : f32
    %2 = vector.broadcast %cst : f32 to vector<2x8xf32>
    %3 = arith.cmpf ogt, %1, %2 : vector<2x8xf32>
    %c0_4 = arith.constant 0 : index
    %c0_5 = arith.constant 0 : index
    %c0_6 = arith.constant 0 : index
    %c0_7 = arith.constant 0 : index
    %4 = vector.load %arg5[%c0_4, %c0_5, %c0_6, %c0_7] : memref<1x2x32x32xf32, #tpu.memory_space<vmem>>, vector<1x2x32x32xf32>
    %5 = vector.shape_cast %4 : vector<1x2x32x32xf32> to vector<2x32x32xf32>
    %c0_8 = arith.constant 0 : index
    %c0_9 = arith.constant 0 : index
    %c0_10 = arith.constant 0 : index
    %6 = vector.load %arg6[%c0_8, %c0_9, %c0_10] : memref<1x64x32xf32, #tpu.memory_space<vmem>>, vector<1x64x32xf32>
    %7 = vector.shape_cast %6 : vector<1x64x32xf32> to vector<64x32xf32>
    %8 = vector.extract_strided_slice %7 {offsets = [0, 0], sizes = [32, 32], strides = [1, 1]} : vector<64x32xf32> to vector<32x32xf32>
    %9 = vector.extract_strided_slice %7 {offsets = [32, 0], sizes = [32, 32], strides = [1, 1]} : vector<64x32xf32> to vector<32x32xf32>
    %c0_11 = arith.constant 0 : index
    %c0_12 = arith.constant 0 : index
    %c0_13 = arith.constant 0 : index
    %10 = vector.load %arg7[%c0_11, %c0_12, %c0_13] : memref<1x64x96xf32, #tpu.memory_space<vmem>>, vector<1x64x96xf32>
    %11 = vector.shape_cast %10 : vector<1x64x96xf32> to vector<64x96xf32>
    %12 = vector.extract_strided_slice %11 {offsets = [0, 0], sizes = [32, 96], strides = [1, 1]} : vector<64x96xf32> to vector<32x96xf32>
    %13 = vector.extract_strided_slice %11 {offsets = [32, 0], sizes = [32, 96], strides = [1, 1]} : vector<64x96xf32> to vector<32x96xf32>
    %c0_14 = arith.constant 0 : index
    %c0_15 = arith.constant 0 : index
    %c0_16 = arith.constant 0 : index
    %14 = vector.load %arg8[%c0_14, %c0_15, %c0_16] : memref<1x5x96xf32, #tpu.memory_space<vmem>>, vector<1x5x96xf32>
    %15 = vector.shape_cast %14 : vector<1x5x96xf32> to vector<5x96xf32>
    %16 = vector.extract_strided_slice %15 {offsets = [0, 0], sizes = [1, 32], strides = [1, 1]} : vector<5x96xf32> to vector<1x32xf32>
    %17 = vector.extract_strided_slice %15 {offsets = [1, 0], sizes = [1, 32], strides = [1, 1]} : vector<5x96xf32> to vector<1x32xf32>
    %18 = vector.extract_strided_slice %15 {offsets = [2, 0], sizes = [1, 32], strides = [1, 1]} : vector<5x96xf32> to vector<1x32xf32>
    %19 = vector.extract_strided_slice %15 {offsets = [3, 0], sizes = [1, 96], strides = [1, 1]} : vector<5x96xf32> to vector<1x96xf32>
    %20 = vector.extract_strided_slice %15 {offsets = [4, 0], sizes = [1, 96], strides = [1, 1]} : vector<5x96xf32> to vector<1x96xf32>
    %21 = vector.extract_strided_slice %0 {offsets = [0, 0, 0], sizes = [1, 8, 32], strides = [1, 1, 1]} : vector<2x8x32xf32> to vector<1x8x32xf32>
    %22 = vector.shape_cast %21 : vector<1x8x32xf32> to vector<8x32xf32>
    %cst_17 = arith.constant dense<0.000000e+00> : vector<8x32xf32>
    %23 = tpu.matmul %22, %9, %cst_17 {dimension_numbers = #tpu.dot_dimension_numbers<[1], [0], [0], [1], [0, 0, 1, 1], [], []>} : vector<8x32xf32>, vector<32x32xf32>, vector<8x32xf32> -> vector<8x32xf32>
    %24 = vector.shape_cast %23 : vector<8x32xf32> to vector<1x8x32xf32>
    %25 = vector.extract_strided_slice %0 {offsets = [1, 0, 0], sizes = [1, 8, 32], strides = [1, 1, 1]} : vector<2x8x32xf32> to vector<1x8x32xf32>
    %26 = vector.shape_cast %25 : vector<1x8x32xf32> to vector<8x32xf32>
    %cst_18 = arith.constant dense<0.000000e+00> : vector<8x32xf32>
    %27 = tpu.matmul %26, %9, %cst_18 {dimension_numbers = #tpu.dot_dimension_numbers<[1], [0], [0], [1], [0, 0, 1, 1], [], []>} : vector<8x32xf32>, vector<32x32xf32>, vector<8x32xf32> -> vector<8x32xf32>
    %28 = vector.shape_cast %27 : vector<8x32xf32> to vector<1x8x32xf32>
    %29 = tpu.concatenate %24, %28 in 0 : vector<1x8x32xf32>, vector<1x8x32xf32> -> vector<2x8x32xf32>
    %30 = tpu.iota {dimensions = array<i32: 1>} : vector<1x8xi32>
    %c0_19 = arith.constant 0 : index
    %c0_20 = arith.constant 0 : index
    %c0_21 = arith.constant 0 : index
    %31 = vector.load %arg2[%c0_19, %c0_20, %c0_21] : memref<1x2x32xf32, #tpu.memory_space<vmem>>, vector<1x2x32xf32>
    %32 = vector.shape_cast %31 : vector<1x2x32xf32> to vector<2x32xf32>
    %33 = vector.shape_cast %32 : vector<2x32xf32> to vector<2x1x32xf32>
    %34 = vector.broadcast %33 : vector<2x1x32xf32> to vector<2x32x32xf32>
    %35 = arith.mulf %5, %34 : vector<2x32x32xf32>
    %cst_22 = arith.constant dense<0.000000e+00> : vector<2x32xf32>
    %36 = vector.multi_reduction <add>, %35, %cst_22 [2] : vector<2x32x32xf32> to vector<2x32xf32>
    %37 = vector.broadcast %16 : vector<1x32xf32> to vector<2x32xf32>
    %38 = arith.addf %36, %37 : vector<2x32xf32>
    %cst_23 = arith.constant dense<0.000000e+00> : vector<2x32xf32>
    %39 = tpu.matmul %38, %8, %cst_23 {dimension_numbers = #tpu.dot_dimension_numbers<[1], [0], [0], [1], [0, 0, 1, 1], [], []>} : vector<2x32xf32>, vector<32x32xf32>, vector<2x32xf32> -> vector<2x32xf32>
    %40 = vector.broadcast %17 : vector<1x32xf32> to vector<2x32xf32>
    %41 = arith.addf %39, %40 : vector<2x32xf32>
    %42 = vector.shape_cast %41 : vector<2x32xf32> to vector<2x1x32xf32>
    %43 = vector.broadcast %42 : vector<2x1x32xf32> to vector<2x8x32xf32>
    %44 = arith.addf %43, %29 : vector<2x8x32xf32>
    %45 = math.tanh %44 : vector<2x8x32xf32>
    %46 = vector.shape_cast %18 : vector<1x32xf32> to vector<1x1x32xf32>
    %47 = vector.broadcast %46 : vector<1x1x32xf32> to vector<2x8x32xf32>
    %48 = arith.mulf %45, %47 : vector<2x8x32xf32>
    %cst_24 = arith.constant dense<0.000000e+00> : vector<2x8xf32>
    %49 = vector.multi_reduction <add>, %48, %cst_24 [2] : vector<2x8x32xf32> to vector<2x8xf32>
    %cst_25 = arith.constant -1.000000e+30 : f32
    %50 = vector.broadcast %cst_25 : f32 to vector<2x8xf32>
    %51 = arith.select %3, %49, %50 : vector<2x8xi1>, vector<2x8xf32>
    %cst_26 = arith.constant dense<0xFF800000> : vector<2xf32>
    %52 = vector.multi_reduction <maximumf>, %51, %cst_26 [1] : vector<2x8xf32> to vector<2xf32>
    %53 = vector.shape_cast %52 : vector<2xf32> to vector<2x1xf32>
    %54 = vector.broadcast %53 : vector<2x1xf32> to vector<2x8xf32>
    %55 = arith.subf %51, %54 : vector<2x8xf32>
    %56 = math.exp %55 : vector<2x8xf32>
    %cst_27 = arith.constant dense<0.000000e+00> : vector<2xf32>
    %57 = vector.multi_reduction <add>, %56, %cst_27 [1] : vector<2x8xf32> to vector<2xf32>
    %58 = vector.shape_cast %57 : vector<2xf32> to vector<2x1xf32>
    %59 = tpu.reciprocal %58 {approx = true} : vector<2x1xf32> -> vector<2x1xf32>
    %60 = arith.index_cast %arg0 : i32 to index
    %c0_28 = arith.constant 0 : index
    %61 = memref.load %arg1[%60, %c0_28] : memref<2x6xi32, #tpu.memory_space<smem>>
    %c0_29 = arith.constant 0 : index
    %62 = arith.index_cast %61 : i32 to index
    %c0_30 = arith.constant 0 : index
    %63 = vector.load %arg3[%c0_29, %62, %c0_30] : memref<2x8x32xf32, #tpu.memory_space<vmem>>, vector<1x1x32xf32>
    %64 = vector.shape_cast %63 : vector<1x1x32xf32> to vector<1x32xf32>
    %65 = vector.broadcast %61 : i32 to vector<1x8xi32>
    %66 = arith.cmpi eq, %30, %65 : vector<1x8xi32>
    %67 = vector.extract_strided_slice %56 {offsets = [0, 0], sizes = [1, 8], strides = [1, 1]} : vector<2x8xf32> to vector<1x8xf32>
    %cst_31 = arith.constant 0.000000e+00 : f32
    %68 = vector.broadcast %cst_31 : f32 to vector<1x8xf32>
    %69 = arith.select %66, %67, %68 : vector<1x8xi1>, vector<1x8xf32>
    %70 = arith.index_cast %arg0 : i32 to index
    %c1 = arith.constant 1 : index
    %71 = memref.load %arg1[%70, %c1] : memref<2x6xi32, #tpu.memory_space<smem>>
    %c1_32 = arith.constant 1 : index
    %72 = arith.index_cast %71 : i32 to index
    %c0_33 = arith.constant 0 : index
    %73 = vector.load %arg3[%c1_32, %72, %c0_33] : memref<2x8x32xf32, #tpu.memory_space<vmem>>, vector<1x1x32xf32>
    %74 = vector.shape_cast %73 : vector<1x1x32xf32> to vector<1x32xf32>
    %75 = vector.broadcast %71 : i32 to vector<1x8xi32>
    %76 = arith.cmpi eq, %30, %75 : vector<1x8xi32>
    %77 = vector.extract_strided_slice %56 {offsets = [1, 0], sizes = [1, 8], strides = [1, 1]} : vector<2x8xf32> to vector<1x8xf32>
    %cst_34 = arith.constant 0.000000e+00 : f32
    %78 = vector.broadcast %cst_34 : f32 to vector<1x8xf32>
    %79 = arith.select %76, %77, %78 : vector<1x8xi1>, vector<1x8xf32>
    %80 = tpu.concatenate %64, %74 in 0 : vector<1x32xf32>, vector<1x32xf32> -> vector<2x32xf32>
    %81 = tpu.concatenate %69, %79 in 0 : vector<1x8xf32>, vector<1x8xf32> -> vector<2x8xf32>
    %cst_35 = arith.constant dense<0.000000e+00> : vector<2xf32>
    %82 = vector.multi_reduction <add>, %81, %cst_35 [1] : vector<2x8xf32> to vector<2xf32>
    %83 = vector.shape_cast %82 : vector<2xf32> to vector<2x1xf32>
    %84 = arith.mulf %83, %59 : vector<2x1xf32>
    %cst_36 = arith.constant dense<0.000000e+00> : vector<2x96xf32>
    %85 = tpu.matmul %80, %12, %cst_36 {dimension_numbers = #tpu.dot_dimension_numbers<[1], [0], [0], [1], [0, 0, 1, 1], [], []>} : vector<2x32xf32>, vector<32x96xf32>, vector<2x96xf32> -> vector<2x96xf32>
    %86 = vector.broadcast %19 : vector<1x96xf32> to vector<2x96xf32>
    %87 = arith.addf %85, %86 : vector<2x96xf32>
    %cst_37 = arith.constant dense<0.000000e+00> : vector<2x96xf32>
    %88 = tpu.matmul %32, %13, %cst_37 {dimension_numbers = #tpu.dot_dimension_numbers<[1], [0], [0], [1], [0, 0, 1, 1], [], []>} : vector<2x32xf32>, vector<32x96xf32>, vector<2x96xf32> -> vector<2x96xf32>
    %89 = vector.broadcast %20 : vector<1x96xf32> to vector<2x96xf32>
    %90 = arith.addf %88, %89 : vector<2x96xf32>
    %91 = vector.extract_strided_slice %87 {offsets = [0, 0], sizes = [2, 32], strides = [1, 1]} : vector<2x96xf32> to vector<2x32xf32>
    %92 = vector.extract_strided_slice %90 {offsets = [0, 0], sizes = [2, 32], strides = [1, 1]} : vector<2x96xf32> to vector<2x32xf32>
    %93 = arith.addf %91, %92 : vector<2x32xf32>
    %94 = arith.negf %93 : vector<2x32xf32>
    %95 = math.exp %94 : vector<2x32xf32>
    %cst_38 = arith.constant 1.000000e+00 : f32
    %96 = vector.broadcast %cst_38 : f32 to vector<2x32xf32>
    %97 = arith.addf %96, %95 : vector<2x32xf32>
    %98 = arith.divf %96, %97 : vector<2x32xf32>
    %99 = vector.extract_strided_slice %87 {offsets = [0, 32], sizes = [2, 32], strides = [1, 1]} : vector<2x96xf32> to vector<2x32xf32>
    %100 = vector.extract_strided_slice %90 {offsets = [0, 32], sizes = [2, 32], strides = [1, 1]} : vector<2x96xf32> to vector<2x32xf32>
    %101 = arith.addf %99, %100 : vector<2x32xf32>
    %102 = arith.negf %101 : vector<2x32xf32>
    %103 = math.exp %102 : vector<2x32xf32>
    %cst_39 = arith.constant 1.000000e+00 : f32
    %104 = vector.broadcast %cst_39 : f32 to vector<2x32xf32>
    %105 = arith.addf %104, %103 : vector<2x32xf32>
    %106 = arith.divf %104, %105 : vector<2x32xf32>
    %107 = vector.extract_strided_slice %87 {offsets = [0, 64], sizes = [2, 32], strides = [1, 1]} : vector<2x96xf32> to vector<2x32xf32>
    %108 = vector.extract_strided_slice %90 {offsets = [0, 64], sizes = [2, 32], strides = [1, 1]} : vector<2x96xf32> to vector<2x32xf32>
    %109 = arith.mulf %98, %108 : vector<2x32xf32>
    %110 = arith.addf %107, %109 : vector<2x32xf32>
    %111 = math.tanh %110 : vector<2x32xf32>
    %cst_40 = arith.constant 1.000000e+00 : f32
    %112 = vector.broadcast %cst_40 : f32 to vector<2x32xf32>
    %113 = arith.subf %112, %106 : vector<2x32xf32>
    %114 = arith.mulf %113, %111 : vector<2x32xf32>
    %115 = arith.mulf %106, %32 : vector<2x32xf32>
    %116 = arith.addf %114, %115 : vector<2x32xf32>
    %117 = vector.shape_cast %116 : vector<2x32xf32> to vector<2x1x32xf32>
    %118 = vector.broadcast %117 : vector<2x1x32xf32> to vector<2x32x32xf32>
    %119 = arith.mulf %5, %118 : vector<2x32x32xf32>
    %cst_41 = arith.constant dense<0.000000e+00> : vector<2x32xf32>
    %120 = vector.multi_reduction <add>, %119, %cst_41 [2] : vector<2x32x32xf32> to vector<2x32xf32>
    %121 = vector.broadcast %16 : vector<1x32xf32> to vector<2x32xf32>
    %122 = arith.addf %120, %121 : vector<2x32xf32>
    %cst_42 = arith.constant dense<0.000000e+00> : vector<2x32xf32>
    %123 = tpu.matmul %122, %8, %cst_42 {dimension_numbers = #tpu.dot_dimension_numbers<[1], [0], [0], [1], [0, 0, 1, 1], [], []>} : vector<2x32xf32>, vector<32x32xf32>, vector<2x32xf32> -> vector<2x32xf32>
    %124 = vector.broadcast %17 : vector<1x32xf32> to vector<2x32xf32>
    %125 = arith.addf %123, %124 : vector<2x32xf32>
    %126 = vector.shape_cast %125 : vector<2x32xf32> to vector<2x1x32xf32>
    %127 = vector.broadcast %126 : vector<2x1x32xf32> to vector<2x8x32xf32>
    %128 = arith.addf %127, %29 : vector<2x8x32xf32>
    %129 = math.tanh %128 : vector<2x8x32xf32>
    %130 = vector.shape_cast %18 : vector<1x32xf32> to vector<1x1x32xf32>
    %131 = vector.broadcast %130 : vector<1x1x32xf32> to vector<2x8x32xf32>
    %132 = arith.mulf %129, %131 : vector<2x8x32xf32>
    %cst_43 = arith.constant dense<0.000000e+00> : vector<2x8xf32>
    %133 = vector.multi_reduction <add>, %132, %cst_43 [2] : vector<2x8x32xf32> to vector<2x8xf32>
    %cst_44 = arith.constant -1.000000e+30 : f32
    %134 = vector.broadcast %cst_44 : f32 to vector<2x8xf32>
    %135 = arith.select %3, %133, %134 : vector<2x8xi1>, vector<2x8xf32>
    %cst_45 = arith.constant dense<0xFF800000> : vector<2xf32>
    %136 = vector.multi_reduction <maximumf>, %135, %cst_45 [1] : vector<2x8xf32> to vector<2xf32>
    %137 = vector.shape_cast %136 : vector<2xf32> to vector<2x1xf32>
    %138 = vector.broadcast %137 : vector<2x1xf32> to vector<2x8xf32>
    %139 = arith.subf %135, %138 : vector<2x8xf32>
    %140 = math.exp %139 : vector<2x8xf32>
    %cst_46 = arith.constant dense<0.000000e+00> : vector<2xf32>
    %141 = vector.multi_reduction <add>, %140, %cst_46 [1] : vector<2x8xf32> to vector<2xf32>
    %142 = vector.shape_cast %141 : vector<2xf32> to vector<2x1xf32>
    %143 = tpu.reciprocal %142 {approx = true} : vector<2x1xf32> -> vector<2x1xf32>
    %144 = arith.index_cast %arg0 : i32 to index
    %c2 = arith.constant 2 : index
    %145 = memref.load %arg1[%144, %c2] : memref<2x6xi32, #tpu.memory_space<smem>>
    %c0_47 = arith.constant 0 : index
    %146 = arith.index_cast %145 : i32 to index
    %c0_48 = arith.constant 0 : index
    %147 = vector.load %arg3[%c0_47, %146, %c0_48] : memref<2x8x32xf32, #tpu.memory_space<vmem>>, vector<1x1x32xf32>
    %148 = vector.shape_cast %147 : vector<1x1x32xf32> to vector<1x32xf32>
    %149 = vector.broadcast %145 : i32 to vector<1x8xi32>
    %150 = arith.cmpi eq, %30, %149 : vector<1x8xi32>
    %151 = vector.extract_strided_slice %140 {offsets = [0, 0], sizes = [1, 8], strides = [1, 1]} : vector<2x8xf32> to vector<1x8xf32>
    %cst_49 = arith.constant 0.000000e+00 : f32
    %152 = vector.broadcast %cst_49 : f32 to vector<1x8xf32>
    %153 = arith.select %150, %151, %152 : vector<1x8xi1>, vector<1x8xf32>
    %154 = arith.index_cast %arg0 : i32 to index
    %c3 = arith.constant 3 : index
    %155 = memref.load %arg1[%154, %c3] : memref<2x6xi32, #tpu.memory_space<smem>>
    %c1_50 = arith.constant 1 : index
    %156 = arith.index_cast %155 : i32 to index
    %c0_51 = arith.constant 0 : index
    %157 = vector.load %arg3[%c1_50, %156, %c0_51] : memref<2x8x32xf32, #tpu.memory_space<vmem>>, vector<1x1x32xf32>
    %158 = vector.shape_cast %157 : vector<1x1x32xf32> to vector<1x32xf32>
    %159 = vector.broadcast %155 : i32 to vector<1x8xi32>
    %160 = arith.cmpi eq, %30, %159 : vector<1x8xi32>
    %161 = vector.extract_strided_slice %140 {offsets = [1, 0], sizes = [1, 8], strides = [1, 1]} : vector<2x8xf32> to vector<1x8xf32>
    %cst_52 = arith.constant 0.000000e+00 : f32
    %162 = vector.broadcast %cst_52 : f32 to vector<1x8xf32>
    %163 = arith.select %160, %161, %162 : vector<1x8xi1>, vector<1x8xf32>
    %164 = tpu.concatenate %148, %158 in 0 : vector<1x32xf32>, vector<1x32xf32> -> vector<2x32xf32>
    %165 = tpu.concatenate %153, %163 in 0 : vector<1x8xf32>, vector<1x8xf32> -> vector<2x8xf32>
    %cst_53 = arith.constant dense<0.000000e+00> : vector<2xf32>
    %166 = vector.multi_reduction <add>, %165, %cst_53 [1] : vector<2x8xf32> to vector<2xf32>
    %167 = vector.shape_cast %166 : vector<2xf32> to vector<2x1xf32>
    %168 = arith.mulf %167, %143 : vector<2x1xf32>
    %cst_54 = arith.constant dense<0.000000e+00> : vector<2x96xf32>
    %169 = tpu.matmul %164, %12, %cst_54 {dimension_numbers = #tpu.dot_dimension_numbers<[1], [0], [0], [1], [0, 0, 1, 1], [], []>} : vector<2x32xf32>, vector<32x96xf32>, vector<2x96xf32> -> vector<2x96xf32>
    %170 = vector.broadcast %19 : vector<1x96xf32> to vector<2x96xf32>
    %171 = arith.addf %169, %170 : vector<2x96xf32>
    %cst_55 = arith.constant dense<0.000000e+00> : vector<2x96xf32>
    %172 = tpu.matmul %116, %13, %cst_55 {dimension_numbers = #tpu.dot_dimension_numbers<[1], [0], [0], [1], [0, 0, 1, 1], [], []>} : vector<2x32xf32>, vector<32x96xf32>, vector<2x96xf32> -> vector<2x96xf32>
    %173 = vector.broadcast %20 : vector<1x96xf32> to vector<2x96xf32>
    %174 = arith.addf %172, %173 : vector<2x96xf32>
    %175 = vector.extract_strided_slice %171 {offsets = [0, 0], sizes = [2, 32], strides = [1, 1]} : vector<2x96xf32> to vector<2x32xf32>
    %176 = vector.extract_strided_slice %174 {offsets = [0, 0], sizes = [2, 32], strides = [1, 1]} : vector<2x96xf32> to vector<2x32xf32>
    %177 = arith.addf %175, %176 : vector<2x32xf32>
    %178 = arith.negf %177 : vector<2x32xf32>
    %179 = math.exp %178 : vector<2x32xf32>
    %cst_56 = arith.constant 1.000000e+00 : f32
    %180 = vector.broadcast %cst_56 : f32 to vector<2x32xf32>
    %181 = arith.addf %180, %179 : vector<2x32xf32>
    %182 = arith.divf %180, %181 : vector<2x32xf32>
    %183 = vector.extract_strided_slice %171 {offsets = [0, 32], sizes = [2, 32], strides = [1, 1]} : vector<2x96xf32> to vector<2x32xf32>
    %184 = vector.extract_strided_slice %174 {offsets = [0, 32], sizes = [2, 32], strides = [1, 1]} : vector<2x96xf32> to vector<2x32xf32>
    %185 = arith.addf %183, %184 : vector<2x32xf32>
    %186 = arith.negf %185 : vector<2x32xf32>
    %187 = math.exp %186 : vector<2x32xf32>
    %cst_57 = arith.constant 1.000000e+00 : f32
    %188 = vector.broadcast %cst_57 : f32 to vector<2x32xf32>
    %189 = arith.addf %188, %187 : vector<2x32xf32>
    %190 = arith.divf %188, %189 : vector<2x32xf32>
    %191 = vector.extract_strided_slice %171 {offsets = [0, 64], sizes = [2, 32], strides = [1, 1]} : vector<2x96xf32> to vector<2x32xf32>
    %192 = vector.extract_strided_slice %174 {offsets = [0, 64], sizes = [2, 32], strides = [1, 1]} : vector<2x96xf32> to vector<2x32xf32>
    %193 = arith.mulf %182, %192 : vector<2x32xf32>
    %194 = arith.addf %191, %193 : vector<2x32xf32>
    %195 = math.tanh %194 : vector<2x32xf32>
    %cst_58 = arith.constant 1.000000e+00 : f32
    %196 = vector.broadcast %cst_58 : f32 to vector<2x32xf32>
    %197 = arith.subf %196, %190 : vector<2x32xf32>
    %198 = arith.mulf %197, %195 : vector<2x32xf32>
    %199 = arith.mulf %190, %116 : vector<2x32xf32>
    %200 = arith.addf %198, %199 : vector<2x32xf32>
    %201 = vector.shape_cast %200 : vector<2x32xf32> to vector<2x1x32xf32>
    %202 = vector.broadcast %201 : vector<2x1x32xf32> to vector<2x32x32xf32>
    %203 = arith.mulf %5, %202 : vector<2x32x32xf32>
    %cst_59 = arith.constant dense<0.000000e+00> : vector<2x32xf32>
    %204 = vector.multi_reduction <add>, %203, %cst_59 [2] : vector<2x32x32xf32> to vector<2x32xf32>
    %205 = vector.broadcast %16 : vector<1x32xf32> to vector<2x32xf32>
    %206 = arith.addf %204, %205 : vector<2x32xf32>
    %cst_60 = arith.constant dense<0.000000e+00> : vector<2x32xf32>
    %207 = tpu.matmul %206, %8, %cst_60 {dimension_numbers = #tpu.dot_dimension_numbers<[1], [0], [0], [1], [0, 0, 1, 1], [], []>} : vector<2x32xf32>, vector<32x32xf32>, vector<2x32xf32> -> vector<2x32xf32>
    %208 = vector.broadcast %17 : vector<1x32xf32> to vector<2x32xf32>
    %209 = arith.addf %207, %208 : vector<2x32xf32>
    %210 = vector.shape_cast %209 : vector<2x32xf32> to vector<2x1x32xf32>
    %211 = vector.broadcast %210 : vector<2x1x32xf32> to vector<2x8x32xf32>
    %212 = arith.addf %211, %29 : vector<2x8x32xf32>
    %213 = math.tanh %212 : vector<2x8x32xf32>
    %214 = vector.shape_cast %18 : vector<1x32xf32> to vector<1x1x32xf32>
    %215 = vector.broadcast %214 : vector<1x1x32xf32> to vector<2x8x32xf32>
    %216 = arith.mulf %213, %215 : vector<2x8x32xf32>
    %cst_61 = arith.constant dense<0.000000e+00> : vector<2x8xf32>
    %217 = vector.multi_reduction <add>, %216, %cst_61 [2] : vector<2x8x32xf32> to vector<2x8xf32>
    %cst_62 = arith.constant -1.000000e+30 : f32
    %218 = vector.broadcast %cst_62 : f32 to vector<2x8xf32>
    %219 = arith.select %3, %217, %218 : vector<2x8xi1>, vector<2x8xf32>
    %cst_63 = arith.constant dense<0xFF800000> : vector<2xf32>
    %220 = vector.multi_reduction <maximumf>, %219, %cst_63 [1] : vector<2x8xf32> to vector<2xf32>
    %221 = vector.shape_cast %220 : vector<2xf32> to vector<2x1xf32>
    %222 = vector.broadcast %221 : vector<2x1xf32> to vector<2x8xf32>
    %223 = arith.subf %219, %222 : vector<2x8xf32>
    %224 = math.exp %223 : vector<2x8xf32>
    %cst_64 = arith.constant dense<0.000000e+00> : vector<2xf32>
    %225 = vector.multi_reduction <add>, %224, %cst_64 [1] : vector<2x8xf32> to vector<2xf32>
    %226 = vector.shape_cast %225 : vector<2xf32> to vector<2x1xf32>
    %227 = tpu.reciprocal %226 {approx = true} : vector<2x1xf32> -> vector<2x1xf32>
    %228 = arith.index_cast %arg0 : i32 to index
    %c4 = arith.constant 4 : index
    %229 = memref.load %arg1[%228, %c4] : memref<2x6xi32, #tpu.memory_space<smem>>
    %230 = vector.broadcast %229 : i32 to vector<1x8xi32>
    %231 = arith.cmpi eq, %30, %230 : vector<1x8xi32>
    %232 = vector.extract_strided_slice %224 {offsets = [0, 0], sizes = [1, 8], strides = [1, 1]} : vector<2x8xf32> to vector<1x8xf32>
    %cst_65 = arith.constant 0.000000e+00 : f32
    %233 = vector.broadcast %cst_65 : f32 to vector<1x8xf32>
    %234 = arith.select %231, %232, %233 : vector<1x8xi1>, vector<1x8xf32>
    %235 = arith.index_cast %arg0 : i32 to index
    %c5 = arith.constant 5 : index
    %236 = memref.load %arg1[%235, %c5] : memref<2x6xi32, #tpu.memory_space<smem>>
    %237 = vector.broadcast %236 : i32 to vector<1x8xi32>
    %238 = arith.cmpi eq, %30, %237 : vector<1x8xi32>
    %239 = vector.extract_strided_slice %224 {offsets = [1, 0], sizes = [1, 8], strides = [1, 1]} : vector<2x8xf32> to vector<1x8xf32>
    %cst_66 = arith.constant 0.000000e+00 : f32
    %240 = vector.broadcast %cst_66 : f32 to vector<1x8xf32>
    %241 = arith.select %238, %239, %240 : vector<1x8xi1>, vector<1x8xf32>
    %242 = tpu.concatenate %234, %241 in 0 : vector<1x8xf32>, vector<1x8xf32> -> vector<2x8xf32>
    %cst_67 = arith.constant dense<0.000000e+00> : vector<2xf32>
    %243 = vector.multi_reduction <add>, %242, %cst_67 [1] : vector<2x8xf32> to vector<2xf32>
    %244 = vector.shape_cast %243 : vector<2xf32> to vector<2x1xf32>
    %245 = arith.mulf %244, %227 : vector<2x1xf32>
    %246 = tpu.concatenate %84, %168, %245 in 1 : vector<2x1xf32>, vector<2x1xf32>, vector<2x1xf32> -> vector<2x3xf32>
    %c0_68 = arith.constant 0 : index
    %c0_69 = arith.constant 0 : index
    %c0_70 = arith.constant 0 : index
    %247 = vector.load %arg9[%c0_68, %c0_69, %c0_70] : memref<1x2x3xf32, #tpu.memory_space<vmem>>, vector<1x2x3xf32>
    %248 = vector.shape_cast %247 : vector<1x2x3xf32> to vector<2x3xf32>
    %249 = vector.shape_cast %246 : vector<2x3xf32> to vector<1x2x3xf32>
    tpu.vector_store %arg9[%c0_68, %c0_69, %c0_70], %249 {strides = array<i32>} : memref<1x2x3xf32, #tpu.memory_space<vmem>>, vector<1x2x3xf32>,
    return
  }
  func.func @transform_0(%arg0: i32, %arg1: memref<2x6xi32, #tpu.memory_space<smem>>) -> (i32, i32, i32) {
    %c0_i32 = arith.constant 0 : i32
    %c0_i32_0 = arith.constant 0 : i32
    %c0_i32_1 = arith.constant 0 : i32
    return %arg0, %c0_i32, %c0_i32_0 : i32, i32, i32
  }
  func.func @transform_1(%arg0: i32, %arg1: memref<2x6xi32, #tpu.memory_space<smem>>) -> (i32, i32, i32) {
    %c0_i32 = arith.constant 0 : i32
    %c0_i32_0 = arith.constant 0 : i32
    %c0_i32_1 = arith.constant 0 : i32
    %c0_i32_2 = arith.constant 0 : i32
    return %c0_i32, %c0_i32_0, %c0_i32_1 : i32, i32, i32
  }
  func.func @transform_2(%arg0: i32, %arg1: memref<2x6xi32, #tpu.memory_space<smem>>) -> (i32, i32) {
    %c0_i32 = arith.constant 0 : i32
    %c0_i32_0 = arith.constant 0 : i32
    %c0_i32_1 = arith.constant 0 : i32
    return %c0_i32, %c0_i32_0 : i32, i32
  }
  func.func @transform_3(%arg0: i32, %arg1: memref<2x6xi32, #tpu.memory_space<smem>>) -> (i32, i32, i32, i32) {
    %c0_i32 = arith.constant 0 : i32
    %c0_i32_0 = arith.constant 0 : i32
    %c0_i32_1 = arith.constant 0 : i32
    %c0_i32_2 = arith.constant 0 : i32
    return %arg0, %c0_i32, %c0_i32_0, %c0_i32_1 : i32, i32, i32, i32
  }
  func.func @transform_4(%arg0: i32, %arg1: memref<2x6xi32, #tpu.memory_space<smem>>) -> (i32, i32, i32) {
    %c0_i32 = arith.constant 0 : i32
    %c0_i32_0 = arith.constant 0 : i32
    %c0_i32_1 = arith.constant 0 : i32
    return %arg0, %c0_i32, %c0_i32_0 : i32, i32, i32
  }
  func.func @transform_5(%arg0: i32, %arg1: memref<2x6xi32, #tpu.memory_space<smem>>) -> (i32, i32, i32) {
    %c0_i32 = arith.constant 0 : i32
    %c0_i32_0 = arith.constant 0 : i32
    %c0_i32_1 = arith.constant 0 : i32
    return %arg0, %c0_i32, %c0_i32_0 : i32, i32, i32
  }
  func.func @transform_6(%arg0: i32, %arg1: memref<2x6xi32, #tpu.memory_space<smem>>) -> (i32, i32, i32) {
    %c0_i32 = arith.constant 0 : i32
    %c0_i32_0 = arith.constant 0 : i32
    %c0_i32_1 = arith.constant 0 : i32
    return %arg0, %c0_i32, %c0_i32_0 : i32, i32, i32
  }
  func.func @transform_7(%arg0: i32, %arg1: memref<2x6xi32, #tpu.memory_space<smem>>) -> (i32, i32, i32) {
    %c0_i32 = arith.constant 0 : i32
    %c0_i32_0 = arith.constant 0 : i32
    %c0_i32_1 = arith.constant 0 : i32
    return %arg0, %c0_i32, %c0_i32_0 : i32, i32, i32
  }
}

</mosaic_0001>

<bundles_post_ra>
// kernel: tpu_custom_call.1
= control target key start
LH: loop header
LB: loop body
LE: loop exit
PB: predicated region body
PF: predicated region fallthrough
CT: control target
= control target key end

     0   :  { %s3120_s0 = inlined_call_operand.vmem [shape: s32[2,6], index: 0, kind: input, shape index: {}]   ;;  %s3121_s1 = inlined_call_operand.vmem [shape: f32[2,2,32], index: 1, kind: input, shape index: {}]   ;;  %s3122_s2 = inlined_call_operand.vmem [shape: f32[2,8,32], index: 2, kind: input, shape index: {}]   ;;  %s3123_s3 = inlined_call_operand.vmem [shape: f32[2,8], index: 3, kind: input, shape index: {}]   ;;  %s3124_s4 = inlined_call_operand.vmem [shape: f32[2,2,32,32], index: 4, kind: input, shape index: {}]   ;;  %s3125_s5 = inlined_call_operand.vmem [shape: f32[2,64,32], index: 5, kind: input, shape index: {}]   ;;  %s3126_s6 = inlined_call_operand.hbm [shape: f32[2,64,96], index: 6, kind: input, shape index: {}]   ;;  %s3127_s7 = inlined_call_operand.vmem [shape: f32[2,5,96], index: 7, kind: input, shape index: {}]   ;;  %s3128_s8 = inlined_call_operand.hbm [shape: f32[2,2,3], index: 8, kind: output, shape index: {}]  }
   0x1   :  { %s13_s29 = sshll.u32 %s3120_s0, 4  ;;  %s14_s29 = int_to_ptr.vmem [resolvable:$true] %s13_s29 }
   0x2   :  { %s2294_s30 = scalar_lea.vmem %s14_s29, 32  ;;  %p2299_p1 = scmp.lt.s32.totalorder %s14_s29, %s14_s29 }
   0x3   :  { %p2295_p0 = scmp.ne.s32.totalorder %s14_s29, %s2294_s30  ;;  %p2300_p2 = scmp.lt.s32.totalorder %s2294_s30, %s2294_s30 }
   0x5   :  { %p2301_p3 = por %p2300_p2, %p2299_p1 }
   0x7   :  { %p2302_p4 = pnand %p2301_p3, %p2295_p0 }
   0x9   :  { %2305 = shalt.err (!%p2302_p4)  }
   0xa   :  { %s2402_s9 = smov [#allocation3]  }
   0xb   :  { %16 = dma.vmem_to_smem %s14_s29, 32, %s2402_s9, [#allocation2] }
   0xc   :  { %2376 = dma.done.wait [#allocation2], 32 }
   0xd   :  { %2377 = vsyncadd [#allocation2], 4294967264 }
   0xe   :  { %18 = sfence }
   0xf   :  { %19 = vsyncpa [#allocation5], 0 }
  0x10   :  { %21 = vsyncpa [#allocation5 + $0x1], 0 }
  0x11   :  { %22 = vsyncpa [#allocation6], 0 }
  0x12   :  { %24 = vsyncpa [#allocation6 + $0x1], 0  ;;  %s2462_s10 = smov 0   ;;  %s2464_s0 = smov 0  }
  0x13   :  { %s2466_s11 = smov 0   ;;  %s2468_s12 = smov 0  }
  0x14 LB: > { %s2483_s13 = sadd.s32 4294967295, %s2400_s12   ;;  %s2020_s14 = sadd.s32 4294967294, %s2400_s12   ;;  %s2400_s12 = sphi %s2468_s12, %s3146_s12   ;;  %s2396_s11 = sphi %s2466_s11, %s3145_s11   ;;  %s2392_s0 = sphi %s2464_s0, %s3144_s0   ;;  %s2388_s10 = sphi %s2462_s10, %s3143_s10  }
  0x15   : > { %s2487_s15 = sadd.s32 1, %s2400_s12   ;;  %s157_s16 = sadd.s32 1, %s2396_s11 }
  0x16   : > { %s154_s17 = ssub.s32 %s2400_s12, %s2487_s15  ;;  %p164_p5 = scmp.ne.s32.totalorder %s2396_s11, %s2392_s0 }
  0x17   : > { %p155_p6 = scmp.eq.s32.totalorder %s154_s17, 0  ;;  %p165_p7 = scmp.eq.s32.totalorder %s2400_s12, 0 }
  0x18   : > { %p170_p8 = scmp.ne.s32.totalorder %s2392_s0, %s2388_s10  ;;  %p171_p9 = scmp.eq.s32.totalorder %s2483_s13, 0 }
  0x19   : > { %s2499_s18 = scalar_select %p155_p6, %s2396_s11, %s157_s16  }
  0x1a   : > { %p2501_p10 = por %p165_p7, %p164_p5  ;;  %p2505_p11 = por %p171_p9, %p170_p8 }
  0x1b   : > { %p220_p12 = scmp.eq.s32.totalorder %s2483_s13, 1  ;;  %p226_p13 = scmp.eq.s32.totalorder %s2020_s14, 1 }
  0x1c   : > { %s3134_s20 = scalar_select %p2505_p11, 1, 0 }
  0x1d   : > { %p2212_p1 = scmp.lt.s32.totalorder %s2400_s12, 2  ;;  %p2512_p2 = por %p220_p12, %p164_p5 }
  0x1e   : > { %p2516_p3 = por %p226_p13, %p170_p8  ;;  %s275_s23 = sand.u32 1, %s2396_s11  }
  0x1f   : > { %s3135_s21 = scalar_select %p2512_p2, 1, 0 }
  0x20   : > { %s3136_s22 = scalar_select %p2516_p3, 1, 0 }
  0x21   : > { %s2053_s24 = sshll.u32 %s2400_s12, 10  ;;  %s2023_s25 = sshll.u32 %s275_s23, 6 }
  0x22   : > { %s2525_s28 = scalar_lea.hbm %s3126_s6, %s2053_s24  ;;  %s279_s29 = scalar_lea.vmem [#allocation4], %s2023_s25 }
  0x23   : > { %s286_s30 = sshll.u32 %s279_s29, 4  ;;  %p2529_p4 = pnand %p2212_p1, %p2501_p10  ;;  %s2533_s30 = int_to_ptr.vmem [resolvable:$true] %s286_s30 }
  0x24   : > { %s2535_s14 = scalar_lea.sflag [#allocation5], %s275_s23  ;;  %s2306_s16 = scalar_lea.hbm %s2525_s28, 1024 }
  0x25   : > { %p2307_p5 = scmp.ne.s32.totalorder %s2525_s28, %s2306_s16  ;;  %p2308_p6 = pneg %p2529_p4 }
  0x26   : > { %s2311_s25 = scalar_lea.hbm %s3126_s6, 2048  ;;  %p2312_p9 = scmp.lt.s32.totalorder %s2525_s28, %s3126_s6 }
  0x27   : > { %p2309_p7 = pnand %p2308_p6, %p2307_p5  ;;  %p2313_p10 = scmp.lt.s32.totalorder %s2311_s25, %s2306_s16 }
  0x29   : > { %p2310_p8 = pneg %p2309_p7  ;;  %p2314_p12 = por %p2313_p10, %p2312_p9 }
  0x2b   : > { %p2315_p13 = pnand %p2314_p12, %p2310_p8 }
  0x2d   : > { %2318 = shalt.err (!%p2315_p13)
}
  0x2e   : > { %s2319_s23 = scalar_lea.vmem %s2533_s30, 1024  ;;  %s2403_s27 = smov [#allocation4]  }
  0x2f   : > { %p2320_p1 = scmp.ne.s32.totalorder %s2533_s30, %s2319_s23  ;;  %s2324_s29 = sshll.u32 %s2403_s27, 4  ;;  %s2325_s29 = int_to_ptr.vmem [resolvable:$false] %s2324_s29 }
  0x30   : > { %s2326_s17 = scalar_lea.vmem %s2325_s29, 2048  ;;  %p2327_p7 = scmp.lt.s32.totalorder %s2533_s30, %s2325_s29 }
  0x31   : > { %p2322_p0 = pnand %p2320_p1, %p2308_p6  ;;  %p2328_p3 = scmp.lt.s32.totalorder %s2326_s17, %s2319_s23 }
  0x33   : > { %p2323_p5 = pneg %p2322_p0  ;;  %p2329_p2 = por %p2328_p3, %p2327_p7 }
  0x35   : > { %p2330_p11 = pnand %p2329_p2, %p2323_p5 }
  0x37   : > { %2333 = shalt.err (!%p2330_p11)
}
  0x38   : > { %s2404_s16 = smov 128   ;;  %s2405_s24 = smov 8  }
  0x39   : > { %2207 = dma.hbm_to_vmem [thread:$0]  (!%p2529_p4), %s2525_s28, 1024, %s2533_s30, %s2535_s14, %s2404_s16, %s2404_s16, %s2405_s24  }
  0x3a   : > { %p2026_p0 = scmp.ge.s32.totalorder %s2400_s12, 1  ;;  %p301_p6 = scmp.lt.s32.totalorder %s2400_s12, 3 }
  0x3c   : > { %p302_p8 = pnand %p2026_p0, %p301_p6 }
  0x3d   : > { %s2559_s25 = sand.u32 (!%p302_p8), 1, %s2392_s0   ;;  %p3138_p11 = scmp.ne.s32.totalorder (!%p302_p8), %s3134_s20, 0 }
  0x3e   : > { %305 = sbr.rel (%p302_p8) target bundleno = 3028 (0xbd4), region = 48  ;;  %s2027_s19 = sshll.u32 (!%p302_p8), %s2559_s25, 6 }
  0x3f   : > { %s308_s26 = scalar_lea.sflag (!%p302_p8), [#allocation5], %s2559_s25  ;;  %s2563_s23 = scalar_lea.vmem (!%p302_p8), [#allocation4], %s2027_s19 }
  0x43   : > { %2379 = dma.done.wait (%p3138_p11), %s308_s26, 1024  }
  0x44   : > { %2381 = vsyncadd (%p3138_p11), %s308_s26, 4294966272  ;;  %p360_p2 = scmp.lt.s32.totalorder %s2483_s13, 1  ;;  %v554_v0 = vlaneseq  ;;  %v2406_v1 = vmov 1966171168   ;;  %vm407_vm0 = vcmask 261120   ;;  %v2407_v39 = vmov 0  }
  0x45   : > { %v559_v2 = vunpack.c.l.s4 %v2406_v1  ;;  %2256 = vset.pattern.permute.xlu0 %v2407_v39  ;;  %2257 = vset.pattern.permute.xlu1 %v2407_v39  ;;  %v2408_v49 = vmov 0.0   ;;  %vm2409_vm1 = vmmov 0   ;;  %v378_v60 = vld [vmem:[%s3122_s2] sm:$0xff]  ;;  %s2694_s29 = sshll.u32 %s2483_s13, 7  ;;  %vm899_vm2 = vcmask 1040384   ;;  %p3140_p4 = scmp.ne.s32.totalorder %s3135_s21, 0 }
  0x46   : > { %s2571_s28 = scalar_select %p360_p2, %s2483_s13, 1  ;;  %v2574_v3 = vshrl.u32 %v554_v0, 7  ;;  %2101 = vmatprep.subr.mxu0 %v2408_v49  ;;  %2112 = vmatprep.subr.mxu1 %v2408_v49  ;;  %vm699_vm3 = vcmask 130112   ;;  %vm706_vm4 = vcmask 195712   ;;  %vm713_vm5 = vcmask 261312  }
  0x47   : > { %v560_v4 = vunpack.c.0.s8 %v559_v2  ;;  %2109 = vmatprep.mubr.msk.f32.mxu0 %vm2409_vm1, %v2408_v49  ;;  %s888_s17 = sadd.s32 1, %s2694_s29  ;;  %2120 = vmatprep.mubr.msk.f32.mxu1 %vm2409_vm1, %v2408_v49  ;;  %s2719_s26 = sld [smem:[#allocation3 + %s2694_s29]]  ;;  %vm734_vm6 = vcmask 1041409   ;;  %vm870_vm8 = vcmask 58368   ;;  %vm1876_vm15 = vcmask 7168  }
  0x48   : > { %s2029_s30 = sshll.u32 %s2571_s28, 1  ;;  %s2054_s27 = sshll.u32 %s2571_s28, 6  ;;  %v2594_v8 = vsub.s32 0, %v2574_v3 }
  0x49   : > { %s363_s20 = scalar_lea.vmem %s3121_s1, %s2029_s30  ;;  %v2582_v5 = vsub.s32 %v560_v4, %v2574_v3  ;;  %s368_s16 = scalar_lea.vmem %s3124_s4, %s2054_s27 }
  0x4a   : > { %v2584_v6 = vld [vmem:[%s363_s20] sm:$0x3]  ;;  %v2599_v12 = vld [vmem:[%s368_s16 + $0x8] sm:$0xff]  ;;  %v2610_v20 = vld [vmem:[%s368_s16 + $0x10] sm:$0xff]  ;;  %s2034_s24 = sshll.u32 %s2571_s28, 3  ;;  %s2645_s20 = scalar_lea.vmem %s3125_s5, %s2054_s27 }
  0x4b   : > { %v564_v7 = vrot.slane %v2584_v6, %v2582_v5  ;;  %v2597_v11 = vld [vmem:[%s368_s16] sm:$0xff]  ;;  %v2605_v16 = vld [vmem:[%s368_s16 + $0x28] sm:$0xff]  ;;  %v2615_v24 = vld [vmem:[%s368_s16 + $0x30] sm:$0xff]  ;;  %s377_s30 = scalar_lea.vmem %s3127_s7, %s2034_s24  ;;  %s2412_s24 = smov 96  }
  0x4c   : > { %v2603_v15 = vld [vmem:[%s368_s16 + $0x20] sm:$0xff]  ;;  %v2620_v28 = vld [vmem:[%s368_s16 + $0x18] sm:$0xff]  ;;  %v396_v53 = vld [vmem:[%s2645_s20 + $0x30] sm:$0xff]  ;;  %s1383_s19 = sadd.s32 3, %s2694_s29  ;;  %s1376_s9 = sadd.s32 2, %s2694_s29 }
  0x4d   : > { %v572_v9 = vrot.slane %v564_v7, %v2582_v5  ;;  %v565_v10 = vcombine.high %v564_v7, %v564_v7  ;;  %v2624_v31 = vld [vmem:[%s368_s16 + $0x38] sm:$0xff]  ;;  %v2636_v38 = vld [vmem:[%s377_s30] sm:$0x1f]  ;;  %v395_v56 = vld [vmem:[%s2645_s20 + $0x28] sm:$0xff]  ;;  %s2705_s16 = sld [smem:[#allocation3 + %s888_s17]]  ;;  %s883_s27 = scalar_lea.vmem %s3122_s2, %s2719_s26 }
  0x4e   : > { %v625_v40 = vrot.slane %v2636_v38, %v2594_v8  ;;  %v397_v50 = vld [vmem:[%s2645_s20 + $0x38] sm:$0xff]  ;;  %v394_v58 = vld [vmem:[%s2645_s20 + $0x20] sm:$0xff]  ;;  %v2684_v2 = vld [vmem:[%s2645_s20 + $0x10] sm:$0xff]  ;;  %s2411_s17 = smov 32   ;;  %s2884_s30 = sld [smem:[#allocation3 + %s1383_s19]] }
  0x4f   : > { %v583_v13 = vrot.slane %v572_v9, %v2594_v8  ;;  %v579_v14 = vrot.slane %v565_v10, %v2582_v5  ;;  %2102 = vmatpush3.msra.mxu0 %v397_v50  ;;  %2113 = vmatpush3.msra.mxu1 %v397_v50  ;;  %v2676_v62 = vld [vmem:[%s2645_s20 + $0x18] sm:$0xff]  ;;  %v2691_v7 = vld [vmem:[%s2645_s20 + $0x8] sm:$0xff]  ;;  %v2701_v10 = vld [vmem:[%s2645_s20] sm:$0xff] }
  0x50   : > { %2103 = vmatprep.subr.mxu0 %v2408_v49  ;;  %2114 = vmatprep.subr.mxu1 %v2408_v49 }
  0x51   : > { %v590_v17 = vmul.f32 %v583_v13, %v2597_v11  ;;  %v587_v18 = vrot.slane %v579_v14, %v2594_v8  ;;  %v591_v19 = vmul.f32 %v583_v13, %v2599_v12  ;;  %v592_v27 = vmul.f32 %v583_v13, %v2610_v20  ;;  %2104 = vmatpush3.msra.mxu0 %v396_v53  ;;  %v379_v14 = vld [vmem:[%s3122_s2 + $0x8] sm:$0xff] }
  0x52   : > { %v593_v33 = vmul.f32 %v583_v13, %v2620_v28  ;;  %2115 = vmatpush3.msra.mxu1 %v396_v53  ;;  %2105 = vmatprep.subr.mxu0 %v2408_v49 }
  0x53   : > { %v598_v21 = vsel %vm407_vm0, %v590_v17, 0.0  ;;  %v594_v22 = vmul.f32 %v587_v18, %v2603_v15  ;;  %v595_v23 = vmul.f32 %v587_v18, %v2605_v16  ;;  %v601_v26 = vsel %vm407_vm0, %v591_v19, 0.0  ;;  %2106 = vmatpush3.msra.mxu0 %v395_v56  ;;  %2116 = vmatprep.subr.mxu1 %v2408_v49  ;;  %v2716_v17 = vld [vmem:[%s2563_s23 + $0x18] sm:$0xff]  ;;  %s1959_s14 = scalar_lea.vmem %s3122_s2, %s2705_s16  ;;  %v2736_v19 = vld [vmem:[%s2563_s23 + $0x8] sm:$0xff] }
  0x54   : > { %599 = vadd.xlane.f32.xlu0 %v598_v21  ;;  %v596_v30 = vmul.f32 %v587_v18, %v2615_v24  ;;  %v604_v32 = vsel %vm407_vm0, %v592_v27, 0.0  ;;  %v597_v35 = vmul.f32 %v587_v18, %v2624_v31  ;;  %v607_v36 = vsel %vm407_vm0, %v593_v33, 0.0  ;;  %2107 = vmatprep.subr.mxu0 %v2408_v49  ;;  %v2725_v18 = vld [vmem:[%s2563_s23 + $0x10] sm:$0xff]  ;;  %v2039_v21 = vld [vmem:[%s1959_s14 + $0x8] sm:$0x1]  ;;  %s2889_s14 = sld [smem:[#allocation3 + %s1376_s9]] }
  0x55   : > { %v610_v25 = vsel %vm407_vm0, %v594_v22, 0.0  ;;  %v613_v29 = vsel %vm407_vm0, %v595_v23, 0.0  ;;  %2108 = vmatpush3.msra.mxu0 %v394_v58  ;;  %2117 = vmatpush3.msra.mxu1 %v395_v56  ;;  %v897_v22 = vrot.slane %v2039_v21, 7  ;;  %v2745_v23 = vld [vmem:[%s2563_s23] sm:$0xff]  ;;  %v2763_v27 = vand.u32 127, %v554_v0  ;;  %s2413_s9 = smov [#allocation7]  }
  0x56   : > { %611 = vadd.xlane.f32.xlu1 %v610_v25  ;;  %v616_v34 = vsel %vm407_vm0, %v596_v30, 0.0  ;;  %v619_v37 = vsel %vm407_vm0, %v597_v35, 0.0  ;;  %2110 = vmatmul.mubr.msk.f32.vlgmr.msra.gmra.mxu0 %vm407_vm0, %v378_v60  ;;  %v884_v25 = vld [vmem:[%s883_s27] sm:$0x1]  ;;  %s1962_s27 = scalar_lea.vmem %s3122_s2, %s2884_s30 }
  0x57   : > { %2123 = vmatprep.subr.mxu0 %v2408_v49  ;;  %2118 = vmatprep.subr.mxu1 %v2408_v49  ;;  %v708_v35 = vadd.s32 4294967272, %v2763_v27  ;;  %v2776_v0 = vsub.s32 %v2763_v27, %v2574_v3  ;;  %v2813_v21 = vld [vmem:[%s2563_s23 + $0x20] sm:$0xff] }
  0x58   : > { %602 = vadd.xlane.f32.xlu0 %v601_v26  ;;  %2124 = vmatpush3.msra.mxu0 %v2676_v62  ;;  %v900_v26 = vsel %vm899_vm2, %v884_v25, %v897_v22 }
  0x59   : > { %2125 = vmatprep.subr.mxu0 %v2408_v49  ;;  %2119 = vmatpush3.msra.mxu1 %v394_v58 }
  0x5a   : > { %614 = vadd.xlane.f32.xlu1 %v613_v29  ;;  %2126 = vmatpush3.msra.mxu0 %v2684_v2 }
  0x5b   : > { %2127 = vmatprep.subr.mxu0 %v2408_v49  ;;  %2131 = vmatprep.mubr.msk.f32.mxu0 %vm2409_vm1, %v2408_v49 }
  0x5c   : > { %605 = vadd.xlane.f32.xlu0 %v604_v32  ;;  %2128 = vmatpush3.msra.mxu0 %v2691_v7  ;;  %v694_v32 = vadd.s32 4294967288, %v2763_v27 }
  0x5d   : > { %2129 = vmatprep.subr.mxu0 %v2408_v49  ;;  %2134 = vmatprep.subr.mxu1 %v2408_v49 }
  0x5e   : > { %617 = vadd.xlane.f32.xlu1 %v616_v34  ;;  %2130 = vmatpush3.msra.mxu0 %v2701_v10  ;;  %v701_v34 = vadd.s32 4294967280, %v2763_v27 }
  0x5f   : > { %2145 = vmatprep.subr.mxu0 %v2408_v49  ;;  %2121 = vmatmul.mubr.msk.f32.vlgmr.msra.gmra.mxu1 %vm407_vm0, %v379_v14  ;;  %v2808_v14 = vld [vmem:[%s2563_s23 + $0x28] sm:$0xff] }
  0x60   : > { %608 = vadd.xlane.f32.xlu0 %v607_v36  ;;  %2135 = vmatpush3.msra.mxu1 %v2716_v17  ;;  %v2772_v39 = vsub.s32 %v701_v34, %v2574_v3 }
  0x61   : > { %2142 = vmatprep.mubr.msk.f32.mxu1 %vm2409_vm1, %v2408_v49  ;;  %2136 = vmatprep.subr.mxu1 %v2408_v49 }
  0x62   : > { %620 = vadd.xlane.f32.xlu1 %v619_v37  ;;  %2137 = vmatpush3.msra.mxu1 %v2725_v18  ;;  %v2769_v37 = vsub.s32 %v694_v32, %v2574_v3 }
  0x63   : > { %2138 = vmatprep.subr.mxu1 %v2408_v49 }
  0x64   : > { %2139 = vmatpush3.msra.mxu1 %v2736_v19 }
  0x65   : > { %2140 = vmatprep.subr.mxu1 %v2408_v49 }
  0x66   : > { %2141 = vmatpush3.msra.mxu1 %v2745_v23 }
  0x67   : > { %2143 = vmatmul.mubr.msk.f32.vlgmr.msra.gmra.mxu1 %vm407_vm0, %v900_v26  ;;  %2156 = vmatprep.subr.mxu1 %v2408_v49 }
  0x68   : > { %2157 = vmatpush3.msra.mxu1 %v2676_v62  ;;  %2164 = vmatprep.mubr.msk.f32.mxu1 %vm2409_vm1, %v2408_v49 }
  0x69   : > { %2158 = vmatprep.subr.mxu1 %v2408_v49 }
  0x6a   : > { %2159 = vmatpush3.msra.mxu1 %v2684_v2 }
  0x6b   : > { %2160 = vmatprep.subr.mxu1 %v2408_v49 }
  0x6c   : > { %2161 = vmatpush3.msra.mxu1 %v2691_v7 }
  0x6d   : > { %2162 = vmatprep.subr.mxu1 %v2408_v49 }
  0x6e   : > { %2163 = vmatpush3.msra.mxu1 %v2701_v10 }
  0x6f   : > { %2178 = vmatprep.subr.mxu1 %v2408_v49 }
  0x73   : > { %632 = vbcast.lane.b32.xlu1 %v625_v40, 264 }
  0x76   : > { %628 = vbcast.lane.b32.xlu0 %v625_v40, 256 }
  0x77   : > { %636 = vbcast.lane.b32.xlu1 %v625_v40, 272 }
  0x7b   : > { %640 = vbcast.lane.b32.xlu1 %v625_v40, 280 }
  0xdd   : > { %v600_v41 = vpop.xlane.xlu0 %599 }
  0xdf   : > { %v612_v42 = vpop.xlane.xlu1 %611 }
  0xe1   : > { %v603_v43 = vpop.xlane.xlu0 %602 }
  0xe3   : > { %v615_v44 = vpop.xlane.xlu1 %614 }
  0xe5   : > { %v606_v45 = vpop.xlane.xlu0 %605 }
  0xe7   : > { %v618_v46 = vpop.xlane.xlu1 %617 }
  0xe9   : > { %v609_v47 = vpop.xlane.xlu0 %608 }
  0xeb   : > { %v621_v48 = vpop.xlane.xlu1 %620 }
  0xed   : > { %v2650_v51 = vpop.permute.xlu0 %628 }
  0xee   : > { %v646_v52 = vadd.f32 %v2650_v51, %v600_v41  ;;  %v650_v4 = vadd.f32 %v2650_v51, %v612_v42  ;;  %v2779_v41 = vsub.s32 %v708_v35, %v2574_v3 }
  0xef   : > { %v2656_v54 = vpop.permute.xlu1 %632 }
  0xf0   : > { %667 = vperm.xlu0 %2256, %v646_v52   ;;  %v647_v55 = vadd.f32 %v2656_v54, %v603_v43  ;;  %v651_v57 = vadd.f32 %v2656_v54, %v615_v44 }
  0xf2   : > { %670 = vperm.xlu1 %2257, %v647_v55  }
  0xf3   : > { %v2665_v59 = vpop.permute.xlu1 %636 }
  0xf4   : > { %682 = vperm.xlu0 %2256, %v651_v57   ;;  %v648_v61 = vadd.f32 %v2665_v59, %v606_v45  ;;  %v652_v63 = vadd.f32 %v2665_v59, %v618_v46 }
  0xf6   : > { %673 = vperm.xlu1 %2257, %v648_v61  }
  0xf7   : > { %v2680_v1 = vpop.permute.xlu1 %640 }
  0xf8   : > { %685 = vperm.xlu0 %2256, %v652_v63   ;;  %v653_v9 = vadd.f32 %v2680_v1, %v621_v48  ;;  %v649_v13 = vadd.f32 %v2680_v1, %v609_v47 }
  0xfa   : > { %679 = vperm.xlu1 %2257, %v650_v4   ;;  %v2796_v4 = vld [vmem:[%s2563_s23 + $0x38] sm:$0xff] }
  0xfc   : > { %688 = vperm.xlu0 %2256, %v653_v9  }
  0xfe   : > { %676 = vperm.xlu1 %2257, %v649_v13   ;;  %v2801_v13 = vld [vmem:[%s2563_s23 + $0x30] sm:$0xff]  ;;  %s3131_s23 = smov 64  }
 0x116   : > { %v2831_v22 = vpop.f32.mrf.mxu0 }
 0x11f   : > { %v2833_v25 = vpop.f32.mrf.mxu1 }
 0x121   : > { %v2122_v26 = vpop.f32.mrf.mxu1 }
 0x16b   : > { %v668_v29 = vpop.permute.xlu0 %667 }
 0x16c   : > { %v693_v50 = vrot.slane %v668_v29, %v2776_v0  ;;  %v979_v29 = vpop.f32.mrf.mxu1 }
 0x16d   : > { %v671_v30 = vpop.permute.xlu1 %670 }
 0x16e   : > { %v698_v43 = vrot.slane %v671_v30, %v2769_v37  ;;  %v2144_v30 = vpop.f32.mrf.mxu1 }
 0x16f   : > { %v683_v33 = vpop.permute.xlu0 %682 }
 0x170   : > { %v722_v44 = vrot.slane %v683_v33, %v2769_v37  ;;  %v700_v57 = vsel %vm699_vm3, %v698_v43, %v693_v50 }
 0x171   : > { %v674_v36 = vpop.permute.xlu1 %673 }
 0x172   : > { %v705_v46 = vrot.slane %v674_v36, %v2772_v39  ;;  %v908_v36 = vsub.s32 3, %v2574_v3 }
 0x173   : > { %v686_v40 = vpop.permute.xlu0 %685 }
 0x174   : > { %v727_v47 = vrot.slane %v686_v40, %v2772_v39  ;;  %v707_v60 = vsel %vm706_vm4, %v705_v46, %v700_v57  ;;  %v2845_v40 = vrot.slane %v2636_v38, %v908_v36 }
 0x175   : > { %v680_v42 = vpop.permute.xlu1 %679 }
 0x176   : > { %v718_v45 = vrot.slane %v680_v42, %v2776_v0  ;;  %v980_v42 = vadd.f32 %v979_v29, %v2845_v40 }
 0x177   : > { %v689_v48 = vpop.permute.xlu0 %688 }
 0x178   : > { %v723_v52 = vsel %vm699_vm3, %v722_v44, %v718_v45  ;;  %v732_v53 = vrot.slane %v689_v48, %v2779_v41 }
 0x179   : > { %v728_v55 = vsel %vm706_vm4, %v727_v47, %v723_v52  ;;  %v677_v56 = vpop.permute.xlu1 %676 }
 0x17a   : > { %v712_v58 = vrot.slane %v677_v56, %v2779_v41  ;;  %v733_v61 = vsel %vm713_vm5, %v732_v53, %v728_v55 }
 0x17c   : > { %v714_v63 = vsel %vm713_vm5, %v712_v58, %v707_v60 }
 0x17d   : > { %v735_v9 = vsel %vm734_vm6, %v733_v61, %v714_v63 }
 0x17e   : > { %2132 = vmatmul.mubr.msk.f32.vlgmr.msra.gmra.mxu0 %vm407_vm0, %v735_v9 }
 0x17f   : > { %2146 = vmatpush3.msra.mxu0 %v2796_v4  ;;  %2153 = vmatprep.mubr.msk.f32.mxu0 %vm2409_vm1, %v2408_v49 }
 0x180   : > { %2147 = vmatprep.subr.mxu0 %v2408_v49 }
 0x181   : > { %2148 = vmatpush3.msra.mxu0 %v2801_v13 }
 0x182   : > { %2149 = vmatprep.subr.mxu0 %v2408_v49 }
 0x183   : > { %2150 = vmatpush3.msra.mxu0 %v2808_v14 }
 0x184   : > { %2151 = vmatprep.subr.mxu0 %v2408_v49 }
 0x185   : > { %2152 = vmatpush3.msra.mxu0 %v2813_v21 }
 0x186   : > { %2154 = vmatmul.mubr.msk.f32.vlgmr.msra.gmra.mxu0 %vm407_vm0, %v2584_v6  ;;  %2167 = vmatprep.subr.mxu0 %v2408_v49 }
 0x187   : > { %2168 = vmatpush3.msra.mxu0 %v2716_v17  ;;  %2175 = vmatprep.mubr.msk.f32.mxu0 %vm2409_vm1, %v2408_v49  ;;  %v2111_v17 = vpop.f32.mrf.mxu0 }
 0x188   : > { %2169 = vmatprep.subr.mxu0 %v2408_v49 }
 0x189   : > { %2170 = vmatpush3.msra.mxu0 %v2725_v18  ;;  %v985_v18 = vsub.s32 4, %v2574_v3 }
 0x18a   : > { %2171 = vmatprep.subr.mxu0 %v2408_v49 }
 0x18b   : > { %2172 = vmatpush3.msra.mxu0 %v2736_v19  ;;  %v2839_v19 = vrot.slane %v2636_v38, %v985_v18 }
 0x18c   : > { %2173 = vmatprep.subr.mxu0 %v2408_v49 }
 0x18d   : > { %2174 = vmatpush3.msra.mxu0 %v2745_v23 }
 0x18e   : > { %2189 = vmatprep.subr.mxu0 %v2408_v49 }
 0x23e   : > { %v2835_v32 = vpop.f32.mrf.mxu0 }
 0x240   : > { %v2133_v33 = vpop.f32.mrf.mxu0 }
 0x246   : > { %v1055_v34 = vpop.f32.mrf.mxu0 }
 0x247   : > { %v1056_v23 = vadd.f32 %v1055_v34, %v2839_v19 }
 0x248   : > { %v2155_v35 = vpop.f32.mrf.mxu0 }
 0x249   : > { %1067 = vrot.lane.b32.xlu1 %v1056_v23, %s3131_s23  ;;  %v1059_v43 = vadd.f32 %v1056_v23, %v980_v42 }
 0x24b   : > { %v2042_v44 = vmul.f32 -1.442695, %v1059_v43 }
 0x24d   : > { %2258 = vpow2.f32 %v2042_v44 }
 0x25a   : > { %v2259_v45 = vpop.eup %2258 }
 0x25b   : > { %v1063_v46 = vadd.f32 1.0, %v2259_v45 }
 0x25d   : > { %2260 = vrcp.f32 %v1063_v46 }
 0x26a   : > { %v2261_v47 = vpop.eup %2260 }
 0x26b   : > { %v1077_v57 = vsub.f32 1.0, %v2261_v47 }
 0x2bb   : > { %v1068_v48 = vpop.permute.xlu1 %1067 }
 0x2bc   : > { %v1070_v50 = vmul.f32 %v2261_v47, %v1068_v48 }
 0x2be   : > { %1072 = vrot.lane.b32.xlu0 %v1070_v50, %s3131_s23  ;;  %s1378_s23 = scalar_lea.vmem %s3122_s2, %s2889_s14 }
 0x2c2   : > { %1083 = vrot.lane.b32.xlu0 %v2584_v6, %s2411_s17 }
 0x330   : > { %v1073_v52 = vpop.permute.xlu0 %1072 }
 0x331   : > { %v1075_v53 = vadd.f32 %v1073_v52, %v980_v42 }
 0x333   : > { %2262 = vtanh.f32 %v1075_v53 }
 0x334   : > { %v1084_v56 = vpop.permute.xlu0 %1083 }
 0x335   : > { %v1086_v60 = vmul.f32 %v2261_v47, %v1084_v56 }
 0x340   : > { %v2263_v55 = vpop.eup %2262 }
 0x341   : > { %1079 = vrot.lane.b32.xlu1 %v2263_v55, %s2412_s24 }
 0x3b3   : > { %v1080_v58 = vpop.permute.xlu1 %1079 }
 0x3b4   : > { %v1082_v61 = vmul.f32 %v1080_v58, %v1077_v57 }
 0x3b6   : > { %v2851_v63 = vadd.f32 %v1086_v60, %v1082_v61 }
 0x3b8   : > { %v1095_v9 = vrot.slane %v2851_v63, %v2582_v5 }
 0x3ba   : > { %v1103_v17 = vrot.slane %v1095_v9, %v2582_v5  ;;  %v1096_v6 = vcombine.high %v1095_v9, %v1095_v9 }
 0x3bc   : > { %v1114_v26 = vrot.slane %v1103_v17, %v2594_v8  ;;  %v1110_v29 = vrot.slane %v1096_v6, %v2582_v5 }
 0x3be   : > { %1119 = vrot.lane.b32.xlu1 %v1114_v26, %s2412_s24  ;;  %v1118_v30 = vrot.slane %v1110_v29, %v2594_v8 }
 0x3c0   : > { %1121 = vrot.lane.b32.xlu0 %v1118_v30, %s2412_s24 }
 0x430   : > { %v1120_v18 = vpop.permute.xlu1 %1119 }
 0x431   : > { %v1125_v33 = vmul.f32 %v1120_v18, %v2597_v11  ;;  %v1126_v34 = vmul.f32 %v1120_v18, %v2599_v12  ;;  %v1127_v42 = vmul.f32 %v1120_v18, %v2610_v20  ;;  %v1128_v46 = vmul.f32 %v1120_v18, %v2620_v28 }
 0x432   : > { %v1122_v23 = vpop.permute.xlu0 %1121 }
 0x433   : > { %v1133_v35 = vsel %vm407_vm0, %v1125_v33, 0.0  ;;  %v1136_v36 = vsel %vm407_vm0, %v1126_v34, 0.0  ;;  %v1129_v43 = vmul.f32 %v1122_v23, %v2603_v15  ;;  %v1139_v44 = vsel %vm407_vm0, %v1127_v42, 0.0  ;;  %v2044_v42 = vld [vmem:[%s1962_s27 + $0x8] sm:$0x1] }
 0x434   : > { %1134 = vadd.xlane.f32.xlu1 %v1133_v35  ;;  %1137 = vadd.xlane.f32.xlu0 %v1136_v36  ;;  %v1130_v47 = vmul.f32 %v1122_v23, %v2605_v16  ;;  %v1142_v48 = vsel %vm407_vm0, %v1128_v46, 0.0  ;;  %v1131_v52 = vmul.f32 %v1122_v23, %v2615_v24  ;;  %v1132_v55 = vmul.f32 %v1122_v23, %v2624_v31 }
 0x435   : > { %v1145_v45 = vsel %vm407_vm0, %v1129_v43, 0.0  ;;  %v1392_v43 = vrot.slane %v2044_v42, 7 }
 0x436   : > { %v1148_v50 = vsel %vm407_vm0, %v1130_v47, 0.0  ;;  %v1151_v53 = vsel %vm407_vm0, %v1131_v52, 0.0  ;;  %v1154_v56 = vsel %vm407_vm0, %v1132_v55, 0.0 }
 0x438   : > { %1140 = vadd.xlane.f32.xlu1 %v1139_v44  ;;  %1146 = vadd.xlane.f32.xlu0 %v1145_v45  ;;  %v1379_v44 = vld [vmem:[%s1378_s23] sm:$0x1]  ;;  %s3139_s23 = smov 64  }
 0x439   : > { %v1394_v45 = vsel %vm899_vm2, %v1379_v44, %v1392_v43 }
 0x43a   : > { %2176 = vmatmul.mubr.msk.f32.vlgmr.msra.gmra.mxu0 %vm407_vm0, %v1394_v45 }
 0x43b   : > { %2190 = vmatpush3.msra.mxu0 %v2676_v62  ;;  %2197 = vmatprep.mubr.msk.f32.mxu0 %vm2409_vm1, %v2408_v49 }
 0x43c   : > { %1143 = vadd.xlane.f32.xlu1 %v1142_v48  ;;  %1149 = vadd.xlane.f32.xlu0 %v1148_v50 }
 0x43d   : > { %2191 = vmatprep.subr.mxu0 %v2408_v49 }
 0x43e   : > { %2192 = vmatpush3.msra.mxu0 %v2684_v2 }
 0x43f   : > { %2193 = vmatprep.subr.mxu0 %v2408_v49 }
 0x440   : > { %1152 = vadd.xlane.f32.xlu0 %v1151_v53  ;;  %2194 = vmatpush3.msra.mxu0 %v2691_v7 }
 0x441   : > { %2195 = vmatprep.subr.mxu0 %v2408_v49 }
 0x442   : > { %2196 = vmatpush3.msra.mxu0 %v2701_v10 }
 0x444   : > { %1155 = vadd.xlane.f32.xlu0 %v1154_v56 }
 0x4bd   : > { %v1135_v57 = vpop.xlane.xlu1 %1134  ;;  %v1138_v58 = vpop.xlane.xlu0 %1137 }
 0x4be   : > { %v1157_v60 = vadd.f32 %v1135_v57, %v2650_v51  ;;  %v1158_v61 = vadd.f32 %v1138_v58, %v2656_v54 }
 0x4c0   : > { %1174 = vperm.xlu1 %2257, %v1157_v60   ;;  %1177 = vperm.xlu0 %2256, %v1158_v61  }
 0x4c1   : > { %v1141_v9 = vpop.xlane.xlu1 %1140  ;;  %v1147_v17 = vpop.xlane.xlu0 %1146 }
 0x4c2   : > { %v1159_v6 = vadd.f32 %v1141_v9, %v2665_v59  ;;  %v1161_v29 = vadd.f32 %v1147_v17, %v2650_v51 }
 0x4c4   : > { %1180 = vperm.xlu1 %2257, %v1159_v6  }
 0x4c5   : > { %v1150_v26 = vpop.xlane.xlu0 %1149  ;;  %v1144_v34 = vpop.xlane.xlu1 %1143 }
 0x4c6   : > { %v1162_v18 = vadd.f32 %v1150_v26, %v2656_v54  ;;  %v1160_v35 = vadd.f32 %v1144_v34, %v2680_v1 }
 0x4c8   : > { %1186 = vperm.xlu1 %2257, %v1161_v29  }
 0x4c9   : > { %v1153_v30 = vpop.xlane.xlu0 %1152 }
 0x4ca   : > { %v1163_v33 = vadd.f32 %v1153_v30, %v2665_v59 }
 0x4cc   : > { %1189 = vperm.xlu1 %2257, %v1162_v18   ;;  %1192 = vperm.xlu0 %2256, %v1163_v33  }
 0x4cd   : > { %v1156_v23 = vpop.xlane.xlu0 %1155 }
 0x4ce   : > { %v1164_v36 = vadd.f32 %v1156_v23, %v2680_v1 }
 0x4d0   : > { %1183 = vperm.xlu1 %2257, %v1160_v35   ;;  %1195 = vperm.xlu0 %2256, %v1164_v36  }
 0x4d4   : > { %1473 = vrot.lane.b32.xlu1 %v2851_v63, %s2412_s24 }
 0x4fa   : > { %v1469_v34 = vpop.f32.mrf.mxu0 }
 0x53b   : > { %v1175_v46 = vpop.permute.xlu1 %1174  ;;  %v1178_v48 = vpop.permute.xlu0 %1177 }
 0x53c   : > { %v1200_v53 = vrot.slane %v1175_v46, %v2776_v0  ;;  %v1204_v55 = vrot.slane %v1178_v48, %v2769_v37 }
 0x53e   : > { %v1205_v61 = vsel %vm699_vm3, %v1204_v55, %v1200_v53 }
 0x53f   : > { %v1181_v47 = vpop.permute.xlu1 %1180 }
 0x540   : > { %v1209_v7 = vrot.slane %v1181_v47, %v2772_v39 }
 0x542   : > { %v1210_v6 = vsel %vm706_vm4, %v1209_v7, %v1205_v61 }
 0x543   : > { %v1187_v50 = vpop.permute.xlu1 %1186 }
 0x544   : > { %v1219_v2 = vrot.slane %v1187_v50, %v2776_v0 }
 0x547   : > { %v1190_v62 = vpop.permute.xlu1 %1189  ;;  %v1193_v52 = vpop.permute.xlu0 %1192 }
 0x548   : > { %v1223_v56 = vrot.slane %v1190_v62, %v2769_v37  ;;  %v1228_v57 = vrot.slane %v1193_v52, %v2772_v39 }
 0x54a   : > { %v1224_v10 = vsel %vm699_vm3, %v1223_v56, %v1219_v2 }
 0x54b   : > { %v1184_v58 = vpop.permute.xlu1 %1183  ;;  %v1196_v60 = vpop.permute.xlu0 %1195  ;;  %v1229_v26 = vsel %vm706_vm4, %v1228_v57, %v1224_v10 }
 0x54c   : > { %v1214_v9 = vrot.slane %v1184_v58, %v2779_v41  ;;  %v1233_v17 = vrot.slane %v1196_v60, %v2779_v41 }
 0x54e   : > { %v1215_v29 = vsel %vm713_vm5, %v1214_v9, %v1210_v6  ;;  %v1234_v30 = vsel %vm713_vm5, %v1233_v17, %v1229_v26 }
 0x54f   : > { %v1235_v18 = vsel %vm734_vm6, %v1234_v30, %v1215_v29  ;;  %v1474_v33 = vpop.permute.xlu1 %1473 }
 0x550   : > { %2165 = vmatmul.mubr.msk.f32.vlgmr.msra.gmra.mxu1 %vm407_vm0, %v1235_v18 }
 0x551   : > { %2179 = vmatpush3.msra.mxu1 %v2796_v4  ;;  %2186 = vmatprep.mubr.msk.f32.mxu1 %vm2409_vm1, %v2408_v49  ;;  %v2177_v4 = vpop.f32.mrf.mxu0  ;;  %vm1880_vm1 = vcmask 17408  }
 0x552   : > { %2180 = vmatprep.subr.mxu1 %v2408_v49 }
 0x553   : > { %2181 = vmatpush3.msra.mxu1 %v2801_v13 }
 0x554   : > { %2182 = vmatprep.subr.mxu1 %v2408_v49 }
 0x555   : > { %2183 = vmatpush3.msra.mxu1 %v2808_v14  ;;  %v1470_v14 = vadd.f32 %v1469_v34, %v2845_v40 }
 0x556   : > { %2184 = vmatprep.subr.mxu1 %v2408_v49 }
 0x557   : > { %2185 = vmatpush3.msra.mxu1 %v2813_v21 }
 0x558   : > { %2187 = vmatmul.mubr.msk.f32.vlgmr.msra.gmra.mxu1 %vm407_vm0, %v1474_v33 }
 0x610   : > { %v2938_v23 = vpop.f32.mrf.mxu1 }
 0x612   : > { %v2166_v35 = vpop.f32.mrf.mxu1 }
 0x618   : > { %v1543_v36 = vpop.f32.mrf.mxu1 }
 0x619   : > { %v1544_v42 = vadd.f32 %v1543_v36, %v2839_v19 }
 0x61a   : > { %v2188_v13 = vpop.f32.mrf.mxu1 }
 0x61b   : > { %1555 = vrot.lane.b32.xlu0 %v1544_v42, %s3139_s23  ;;  %v1547_v43 = vadd.f32 %v1544_v42, %v1470_v14 }
 0x61d   : > { %v2047_v49 = vmul.f32 -1.442695, %v1547_v43 }
 0x61f   : > { %2264 = vpow2.f32 %v2047_v49 }
 0x62c   : > { %v2265_v44 = vpop.eup %2264 }
 0x62d   : > { %v1551_v21 = vadd.f32 1.0, %v2265_v44 }
 0x62f   : > { %2266 = vrcp.f32 %v1551_v21 }
 0x63c   : > { %v2267_v45 = vpop.eup %2266 }
 0x63d   : > { %v1565_v62 = vsub.f32 1.0, %v2267_v45  ;;  %v1571_v40 = vmul.f32 %v2267_v45, %v2851_v63 }
 0x68d   : > { %v1556_v46 = vpop.permute.xlu0 %1555 }
 0x68e   : > { %v1558_v47 = vmul.f32 %v2267_v45, %v1556_v46 }
 0x690   : > { %1560 = vrot.lane.b32.xlu1 %v1558_v47, %s3139_s23 }
 0x702   : > { %v1561_v48 = vpop.permute.xlu1 %1560 }
 0x703   : > { %v1563_v50 = vadd.f32 %v1561_v48, %v1470_v14 }
 0x705   : > { %2268 = vtanh.f32 %v1563_v50 }
 0x712   : > { %v2269_v19 = vpop.eup %2268 }
 0x713   : > { %1567 = vrot.lane.b32.xlu0 %v2269_v19, %s2412_s24 }
 0x785   : > { %v1568_v52 = vpop.permute.xlu0 %1567 }
 0x786   : > { %v1570_v53 = vmul.f32 %v1568_v52, %v1565_v62 }
 0x788   : > { %v1572_v55 = vadd.f32 %v1571_v40, %v1570_v53 }
 0x78a   : > { %v1580_v2 = vrot.slane %v1572_v55, %v2582_v5 }
 0x78c   : > { %v1581_v56 = vcombine.high %v1580_v2, %v1580_v2  ;;  %v1588_v7 = vrot.slane %v1580_v2, %v2582_v5 }
 0x78e   : > { %v1599_v57 = vrot.slane %v1588_v7, %v2594_v8  ;;  %v1595_v10 = vrot.slane %v1581_v56, %v2582_v5 }
 0x790   : > { %1604 = vrot.lane.b32.xlu1 %v1599_v57, %s2412_s24  ;;  %v1603_v58 = vrot.slane %v1595_v10, %v2594_v8 }
 0x792   : > { %1606 = vrot.lane.b32.xlu0 %v1603_v58, %s2412_s24  ;;  %s1883_s24 = scalar_lea.sflag [#allocation6], %s2559_s25 }
 0x802   : > { %v1605_v60 = vpop.permute.xlu1 %1604 }
 0x803   : > { %v1610_v63 = vmul.f32 %v1605_v60, %v2597_v11  ;;  %v1611_v61 = vmul.f32 %v1605_v60, %v2599_v12  ;;  %v1612_v26 = vmul.f32 %v1605_v60, %v2610_v20  ;;  %v1613_v33 = vmul.f32 %v1605_v60, %v2620_v28 }
 0x804   : > { %v1607_v9 = vpop.permute.xlu0 %1606 }
 0x805   : > { %v1618_v17 = vsel %vm407_vm0, %v1610_v63, 0.0  ;;  %v1621_v6 = vsel %vm407_vm0, %v1611_v61, 0.0  ;;  %v1614_v29 = vmul.f32 %v1607_v9, %v2603_v15  ;;  %v1624_v30 = vsel %vm407_vm0, %v1612_v26, 0.0 }
 0x806   : > { %1619 = vadd.xlane.f32.xlu1 %v1618_v17  ;;  %1622 = vadd.xlane.f32.xlu0 %v1621_v6  ;;  %v1615_v11 = vmul.f32 %v1607_v9, %v2605_v16  ;;  %v1627_v12 = vsel %vm407_vm0, %v1613_v33, 0.0  ;;  %v1616_v20 = vmul.f32 %v1607_v9, %v2615_v24  ;;  %v1617_v4 = vmul.f32 %v1607_v9, %v2624_v31 }
 0x807   : > { %v1630_v18 = vsel %vm407_vm0, %v1614_v29, 0.0  ;;  %v656_v16 = vsub.s32 1, %v2574_v3  ;;  %v847_v63 = vsub.s32 2, %v2574_v3 }
 0x808   : > { %v1633_v34 = vsel %vm407_vm0, %v1615_v11, 0.0  ;;  %v1636_v15 = vsel %vm407_vm0, %v1616_v20, 0.0  ;;  %v1639_v35 = vsel %vm407_vm0, %v1617_v4, 0.0 }
 0x809   : > { %v2971_v42 = vrot.slane %v2636_v38, %v656_v16  ;;  %v3001_v9 = vrot.slane %v2636_v38, %v847_v63 }
 0x80a   : > { %1625 = vadd.xlane.f32.xlu1 %v1624_v30  ;;  %1631 = vadd.xlane.f32.xlu0 %v1630_v18 }
 0x80b   : > { %v805_v31 = vadd.f32 %v2835_v32, %v2971_v42  ;;  %v1305_v48 = vadd.f32 %v2938_v23, %v2971_v42 }
 0x80d   : > { %v815_v21 = vrot.slane %v805_v31, %v2582_v5  ;;  %v1315_v40 = vrot.slane %v1305_v48, %v2582_v5 }
 0x80e   : > { %1628 = vadd.xlane.f32.xlu1 %v1627_v12  ;;  %1634 = vadd.xlane.f32.xlu0 %v1633_v34 }
 0x80f   : > { %v816_v47 = vcombine.high %v815_v21, %v815_v21  ;;  %v1316_v55 = vcombine.high %v1315_v40, %v1315_v40 }
 0x811   : > { %v830_v52 = vrot.slane %v816_v47, %v2582_v5  ;;  %v1330_v56 = vrot.slane %v1316_v55, %v2582_v5 }
 0x812   : > { %1637 = vadd.xlane.f32.xlu0 %v1636_v15 }
 0x813   : > { %v838_v23 = vrot.slane %v830_v52, %v2594_v8 }
 0x815   : > { %v842_v2 = vadd.f32 %v838_v23, %v2833_v25 }
 0x816   : > { %1640 = vadd.xlane.f32.xlu0 %v1639_v35 }
 0x817   : > { %2270 = vtanh.f32 %v842_v2 }
 0x824   : > { %v2271_v61 = vpop.eup %2270 }
 0x825   : > { %v850_v17 = vmul.f32 %v2271_v61, %v3001_v9 }
 0x827   : > { %v854_v29 = vsel %vm407_vm0, %v850_v17, 0.0 }
 0x88f   : > { %v1620_v28 = vpop.xlane.xlu1 %1619  ;;  %v1623_v36 = vpop.xlane.xlu0 %1622 }
 0x890   : > { %v1642_v13 = vadd.f32 %v1620_v28, %v2650_v51  ;;  %v1643_v24 = vadd.f32 %v1623_v36, %v2656_v54 }
 0x892   : > { %1659 = vperm.xlu1 %2257, %v1642_v13   ;;  %1662 = vperm.xlu0 %2256, %v1643_v24  }
 0x893   : > { %v1626_v14 = vpop.xlane.xlu1 %1625  ;;  %v1632_v43 = vpop.xlane.xlu0 %1631 }
 0x894   : > { %v1644_v49 = vadd.f32 %v1626_v14, %v2665_v59  ;;  %v1646_v45 = vadd.f32 %v1632_v43, %v2650_v51 }
 0x896   : > { %1665 = vperm.xlu1 %2257, %v1644_v49  }
 0x897   : > { %v1635_v44 = vpop.xlane.xlu0 %1634  ;;  %v1629_v62 = vpop.xlane.xlu1 %1628 }
 0x898   : > { %v1647_v50 = vadd.f32 %v1635_v44, %v2656_v54  ;;  %v1645_v51 = vadd.f32 %v1629_v62, %v2680_v1  ;;  %v1323_v54 = vrot.slane %v1315_v40, %v2582_v5 }
 0x89a   : > { %1671 = vperm.xlu1 %2257, %v1646_v45   ;;  %v1334_v7 = vrot.slane %v1323_v54, %v2594_v8 }
 0x89b   : > { %v1638_v46 = vpop.xlane.xlu0 %1637 }
 0x89c   : > { %v1648_v19 = vadd.f32 %v1638_v46, %v2665_v59  ;;  %v823_v59 = vrot.slane %v815_v21, %v2582_v5  ;;  %v1341_v10 = vadd.f32 %v1334_v7, %v2831_v22 }
 0x89e   : > { %1674 = vperm.xlu1 %2257, %v1647_v50   ;;  %1677 = vperm.xlu0 %2256, %v1648_v19   ;;  %v834_v57 = vrot.slane %v823_v59, %v2594_v8  ;;  %2272 = vtanh.f32 %v1341_v10 }
 0x89f   : > { %v1641_v32 = vpop.xlane.xlu0 %1640 }
 0x8a0   : > { %v1649_v53 = vadd.f32 %v1641_v32, %v2680_v1  ;;  %v1338_v1 = vrot.slane %v1330_v56, %v2594_v8  ;;  %v841_v58 = vadd.f32 %v834_v57, %v2831_v22 }
 0x8a2   : > { %1668 = vperm.xlu1 %2257, %v1645_v51   ;;  %1680 = vperm.xlu0 %2256, %v1649_v53   ;;  %v1342_v60 = vadd.f32 %v1338_v1, %v2833_v25  ;;  %2274 = vtanh.f32 %v841_v58 }
 0x8a4   : > { %2276 = vtanh.f32 %v1342_v60 }
 0x8ab   : > { %v2273_v6 = vpop.eup %2272 }
 0x8ac   : > { %v1345_v30 = vmul.f32 %v2273_v6, %v3001_v9 }
 0x8ae   : > { %v1347_v11 = vsel %vm407_vm0, %v1345_v30, 0.0 }
 0x8af   : > { %v2275_v26 = vpop.eup %2274 }
 0x8b0   : > { %v849_v33 = vmul.f32 %v2275_v26, %v3001_v9 }
 0x8b1   : > { %v2277_v18 = vpop.eup %2276 }
 0x8b2   : > { %v1346_v3 = vmul.f32 %v2277_v18, %v3001_v9  ;;  %v851_v38 = vsel %vm407_vm0, %v849_v33, 0.0 }
 0x8b4   : > { %v1350_v12 = vsel %vm407_vm0, %v1346_v3, 0.0 }
 0x8c1   : > { %855 = vadd.xlane.f32.xlu0 %v854_v29 }
 0x8c5   : > { %1348 = vadd.xlane.f32.xlu0 %v1347_v11 }
 0x8c6   : > { %852 = vadd.xlane.f32.xlu1 %v851_v38 }
 0x8c9   : > { %1351 = vadd.xlane.f32.xlu0 %v1350_v12 }
 0x90d   : > { %v1660_v34 = vpop.permute.xlu1 %1659  ;;  %v1663_v15 = vpop.permute.xlu0 %1662 }
 0x90e   : > { %v1685_v28 = vrot.slane %v1660_v34, %v2776_v0  ;;  %v1689_v36 = vrot.slane %v1663_v15, %v2769_v37 }
 0x910   : > { %v1690_v21 = vsel %vm699_vm3, %v1689_v36, %v1685_v28  ;;  %v885_v28 = vstv %s2719_s26  ;;  %v893_v36 = vstv %s2705_s16  ;;  %s1861_s16 = sadd.s32 4, %s2694_s29  ;;  %s1866_s26 = sadd.s32 5, %s2694_s29 }
 0x911   : > { %v1666_v20 = vpop.permute.xlu1 %1665  ;;  %vm886_vm9 = vcmp.eq.s32.totalorder %v2763_v27, %v885_v28  ;;  %vm894_vm10 = vcmp.eq.s32.totalorder %v2763_v27, %v893_v36  ;;  %s1862_s20 = sld [smem:[#allocation3 + %s1861_s16]]  ;;  %s2028_s29 = sshll.u32 %s2559_s25, 1 }
 0x912   : > { %v1694_v14 = vrot.slane %v1666_v20, %v2772_v39  ;;  %s1867_s28 = sld [smem:[#allocation3 + %s1866_s26]]  ;;  %s2338_s16 = sshll.u32 %s2413_s9, 4  ;;  %s2339_s16 = int_to_ptr.vmem [resolvable:$false] %s2338_s16 }
 0x913   : > { %s2340_s26 = scalar_lea.vmem %s2339_s16, 64 }
 0x914   : > { %v1695_v47 = vsel %vm706_vm4, %v1694_v14, %v1690_v21 }
 0x915   : > { %v1672_v4 = vpop.permute.xlu1 %1671 }
 0x916   : > { %v1704_v13 = vrot.slane %v1672_v4, %v2776_v0 }
 0x919   : > { %v1675_v35 = vpop.permute.xlu1 %1674  ;;  %v1678_v16 = vpop.permute.xlu0 %1677 }
 0x91a   : > { %v1708_v24 = vrot.slane %v1675_v35, %v2769_v37  ;;  %v1713_v43 = vrot.slane %v1678_v16, %v2772_v39 }
 0x91c   : > { %v1709_v31 = vsel %vm699_vm3, %v1708_v24, %v1704_v13 }
 0x91d   : > { %v1669_v49 = vpop.permute.xlu1 %1668  ;;  %v1681_v44 = vpop.permute.xlu0 %1680  ;;  %v1714_v48 = vsel %vm706_vm4, %v1713_v43, %v1709_v31 }
 0x91e   : > { %v1699_v45 = vrot.slane %v1669_v49, %v2779_v41  ;;  %v1718_v46 = vrot.slane %v1681_v44, %v2779_v41 }
 0x920   : > { %v1700_v37 = vsel %vm713_vm5, %v1699_v45, %v1695_v47  ;;  %v1719_v50 = vsel %vm713_vm5, %v1718_v46, %v1714_v48  ;;  %v1380_v47 = vstv %s2889_s14  ;;  %v1388_v48 = vstv %s2884_s30  ;;  %s2050_s30 = sshll.u32 %s2483_s13, 5  ;;  %s359_s14 = scalar_lea.vmem [#allocation7], %s2028_s29 }
 0x921   : > { %v1720_v39 = vsel %vm734_vm6, %v1719_v50, %v1700_v37  ;;  %v1863_v37 = vstv %s1862_s20  ;;  %v1868_v50 = vstv %s1867_s28  ;;  %vm1381_vm11 = vcmp.eq.s32.totalorder %v2763_v27, %v1380_v47  ;;  %s1896_s27 = sshll.u32 %s359_s14, 4  ;;  %s3083_s23 = scalar_lea.hbm %s3128_s8, %s2050_s30  ;;  %s1897_s27 = int_to_ptr.vmem [resolvable:$true] %s1896_s27 }
 0x922   : > { %2198 = vmatmul.mubr.msk.f32.vlgmr.msra.gmra.mxu0 %vm407_vm0, %v1720_v39  ;;  %vm1389_vm12 = vcmp.eq.s32.totalorder %v2763_v27, %v1388_v48  ;;  %vm1864_vm13 = vcmp.eq.s32.totalorder %v2763_v27, %v1863_v37  ;;  %vm1869_vm14 = vcmp.eq.s32.totalorder %v2763_v27, %v1868_v50  ;;  %s2334_s13 = scalar_lea.vmem %s1897_s27, 32  ;;  %p2341_p12 = scmp.lt.s32.totalorder %s1897_s27, %s2339_s16 }
 0x923   : > { %p2335_p3 = scmp.ne.s32.totalorder %s1897_s27, %s2334_s13  ;;  %p2342_p13 = scmp.lt.s32.totalorder %s2340_s26, %s2334_s13 }
 0x925   : > { %p2336_p9 = pnand %p2335_p3, %p3140_p4  ;;  %p2343_p1 = por %p2342_p13, %p2341_p12 }
 0x927   : > { %p2337_p10 = pneg %p2336_p9 }
 0x929   : > { %p2344_p5 = pnand %p2343_p1, %p2337_p10 }
 0x94a   : > { %v856_v23 = vpop.xlane.xlu0 %855 }
 0x94b   : > { %v866_v57 = vrot.slane %v856_v23, %v2776_v0 }
 0x94f   : > { %v853_v2 = vpop.xlane.xlu1 %852 }
 0x950   : > { %v862_v7 = vrot.slane %v853_v2, %v2776_v0 }
 0x952   : > { %v867_v10 = vsel %vm734_vm6, %v866_v57, %v862_v7 }
 0x9e2   : > { %v1789_v19 = vpop.f32.mrf.mxu0 }
 0x9e3   : > { %v1790_v62 = vadd.f32 %v1789_v19, %v2971_v42  ;;  %v1349_v42 = vpop.xlane.xlu0 %1348 }
 0x9e4   : > { %v2199_v32 = vpop.f32.mrf.mxu0 }
 0x9e5   : > { %v1800_v52 = vrot.slane %v1790_v62, %v2582_v5 }
 0x9e7   : > { %v1801_v40 = vcombine.high %v1800_v52, %v1800_v52  ;;  %v1808_v41 = vrot.slane %v1800_v52, %v2582_v5  ;;  %v1352_v56 = vpop.xlane.xlu0 %1351 }
 0x9e8   : > { %v1362_v1 = vrot.slane %v1352_v56, %v2776_v0 }
 0x9e9   : > { %v1815_v51 = vrot.slane %v1801_v40, %v2582_v5  ;;  %v1819_v53 = vrot.slane %v1808_v41, %v2594_v8  ;;  %v380_v5 = vld [vmem:[%s3123_s3] sm:$0x3] }
 0x9ea   : > { %vm381_vm7 = vcmp.gt.f32.partialorder %v380_v5, 0.5 }
 0x9eb   : > { %v1823_v55 = vrot.slane %v1815_v51, %v2594_v8  ;;  %v1826_v54 = vadd.f32 %v1819_v53, %v2831_v22  ;;  %v1358_v22 = vrot.slane %v1349_v42, %v2776_v0  ;;  %v869_v17 = vsel %vm381_vm7, %v867_v10, -1e+30 }
 0x9ec   : > { %v871_v29 = vsel %vm870_vm8, %v869_v17, -inf }
 0x9ed   : > { %v1827_v59 = vadd.f32 %v1823_v55, %v2833_v25  ;;  %2278 = vtanh.f32 %v1826_v54  ;;  %v1363_v61 = vsel %vm734_vm6, %v1362_v1, %v1358_v22 }
 0x9ee   : > { %v1365_v26 = vsel %vm381_vm7, %v1363_v61, -1e+30 }
 0x9ef   : > { %2280 = vtanh.f32 %v1827_v59  ;;  %v1366_v30 = vsel %vm870_vm8, %v1365_v26, -inf }
 0x9fa   : > { %v2279_v8 = vpop.eup %2278 }
 0x9fb   : > { %v1830_v25 = vmul.f32 %v2279_v8, %v3001_v9 }
 0x9fc   : > { %v2281_v58 = vpop.eup %2280 }
 0x9fd   : > { %v1832_v60 = vsel %vm407_vm0, %v1830_v25, 0.0  ;;  %v1831_v63 = vmul.f32 %v2281_v58, %v3001_v9 }
 0x9fe   : > { %1833 = vadd.xlane.f32.xlu1 %v1832_v60 }
 0x9ff   : > { %v1835_v6 = vsel %vm407_vm0, %v1831_v63, 0.0  ;;  %vm1878_vm0 = vcmask 15360  }
 0xa00   : > { %1836 = vadd.xlane.f32.xlu0 %v1835_v6 }
 0xa02   : > { %872 = vmax.xlane.f32.xlu1 %v871_v29 }
 0xa04   : > { %1367 = vmax.xlane.f32.xlu0 %v1366_v30 }
 0xa87   : > { %v1834_v18 = vpop.xlane.xlu1 %1833 }
 0xa88   : > { %v1843_v33 = vrot.slane %v1834_v18, %v2776_v0 }
 0xa89   : > { %v1837_v9 = vpop.xlane.xlu0 %1836 }
 0xa8a   : > { %v1847_v11 = vrot.slane %v1837_v9, %v2776_v0 }
 0xa8b   : > { %v873_v3 = vpop.xlane.xlu1 %872 }
 0xa8c   : > { %v874_v38 = vsub.f32 %v869_v17, %v873_v3  ;;  %v1848_v12 = vsel %vm734_vm6, %v1847_v11, %v1843_v33 }
 0xa8d   : > { %v1368_v34 = vpop.xlane.xlu0 %1367  ;;  %v1850_v20 = vsel %vm381_vm7, %v1848_v12, -1e+30 }
 0xa8e   : > { %v875_v15 = vmul.f32 1.442695, %v874_v38  ;;  %v1369_v4 = vsub.f32 %v1365_v26, %v1368_v34  ;;  %v1851_v35 = vsel %vm870_vm8, %v1850_v20, -inf }
 0xa8f   : > { %1852 = vmax.xlane.f32.xlu1 %v1851_v35 }
 0xa90   : > { %2282 = vpow2.f32 %v875_v15  ;;  %v1370_v16 = vmul.f32 1.442695, %v1369_v4 }
 0xa92   : > { %2284 = vpow2.f32 %v1370_v16 }
 0xa9d   : > { %v2283_v0 = vpop.eup %2282 }
 0xa9e   : > { %v877_v13 = vsel %vm870_vm8, %v2283_v0, 0.0  ;;  %v887_v24 = vsel %vm886_vm9, %v2283_v0, 0.0  ;;  %v895_v14 = vsel %vm894_vm10, %v2283_v0, 0.0 }
 0xa9f   : > { %v2285_v43 = vpop.eup %2284  ;;  %878 = vadd.xlane.f32.xlu0 %v877_v13  ;;  %v901_v49 = vsel %vm899_vm2, %v887_v24, %v895_v14 }
 0xaa0   : > { %v1372_v31 = vsel %vm870_vm8, %v2285_v43, 0.0  ;;  %v902_v44 = vsel %vm870_vm8, %v901_v49, 0.0  ;;  %v1382_v39 = vsel %vm1381_vm11, %v2285_v43, 0.0  ;;  %v1390_v19 = vsel %vm1389_vm12, %v2285_v43, 0.0 }
 0xaa1   : > { %1373 = vadd.xlane.f32.xlu1 %v1372_v31  ;;  %v1395_v51 = vsel %vm899_vm2, %v1382_v39, %v1390_v19 }
 0xaa2   : > { %v1396_v23 = vsel %vm870_vm8, %v1395_v51, 0.0 }
 0xaa5   : > { %903 = vadd.xlane.f32.xlu1 %v902_v44 }
 0xb18   : > { %v1853_v21 = vpop.xlane.xlu1 %1852 }
 0xb19   : > { %v1854_v45 = vsub.f32 %v1850_v20, %v1853_v21 }
 0xb1b   : > { %v1855_v46 = vmul.f32 1.442695, %v1854_v45 }
 0xb1d   : > { %2286 = vpow2.f32 %v1855_v46 }
 0xb28   : > { %v879_v27 = vpop.xlane.xlu0 %878 }
 0xb29   : > { %2288 = vrcp.f32 %v879_v27 }
 0xb2a   : > { %v2287_v62 = vpop.eup %2286  ;;  %v1374_v55 = vpop.xlane.xlu1 %1373 }
 0xb2b   : > { %v1857_v32 = vsel %vm870_vm8, %v2287_v62, 0.0  ;;  %v1865_v52 = vsel %vm1864_vm13, %v2287_v62, 0.0  ;;  %v1870_v40 = vsel %vm1869_vm14, %v2287_v62, 0.0  ;;  %2290 = vrcp.f32 %v1374_v55 }
 0xb2c   : > { %1858 = vadd.xlane.f32.xlu0 %v1857_v32  ;;  %v1871_v41 = vsel %vm899_vm2, %v1865_v52, %v1870_v40 }
 0xb2d   : > { %v1872_v53 = vsel %vm870_vm8, %v1871_v41, 0.0 }
 0xb2e   : > { %1873 = vadd.xlane.f32.xlu1 %v1872_v53  ;;  %v904_v2 = vpop.xlane.xlu1 %903 }
 0xb30   : > { %1397 = vadd.xlane.f32.xlu0 %v1396_v23 }
 0xb36   : > { %v2289_v42 = vpop.eup %2288 }
 0xb37   : > { %v905_v57 = vmul.f32 %v2289_v42, %v904_v2 }
 0xb38   : > { %v2291_v56 = vpop.eup %2290 }
 0xbb5   : > { %v1859_v54 = vpop.xlane.xlu0 %1858 }
 0xbb6   : > { %2292 = vrcp.f32 %v1859_v54 }
 0xbb7   : > { %v1874_v1 = vpop.xlane.xlu1 %1873 }
 0xbb9   : > { %v1398_v59 = vpop.xlane.xlu0 %1397 }
 0xbba   : > { %v1399_v7 = vmul.f32 %v2291_v56, %v1398_v59 }
 0xbbc   : > { %v1877_v22 = vsel %vm1876_vm15, %v905_v57, %v1399_v7 }
 0xbc3   : > { %v2293_v5 = vpop.eup %2292 }
 0xbc4   : > { %v1875_v8 = vmul.f32 %v2293_v5, %v1874_v1 }
 0xbc6   : > { %v1879_v25 = vsel %vm1878_vm0, %v1877_v22, %v1875_v8 }
 0xbc7   : > { %1881 = vst.msk [vmem:[%s359_s14] sm:$0x3] %vm1880_vm1, %v1879_v25 }
 0xbc8   : > { %2347 = shalt.err (!%p2344_p5)
}
 0xbc9   : > { %s2348_s20 = scalar_lea.hbm %s3083_s23, 32  ;;  %s2352_s29 = scalar_lea.hbm %s3128_s8, 64 }
 0xbca   : > { %p2349_p7 = scmp.ne.s32.totalorder %s3083_s23, %s2348_s20  ;;  %p2353_p8 = scmp.lt.s32.totalorder %s3083_s23, %s3128_s8 }
 0xbcb   : > { %p2354_p11 = scmp.lt.s32.totalorder %s2352_s29, %s2348_s20 }
 0xbcc   : > { %p2350_p0 = pnand %p2349_p7, %p3140_p4 }
 0xbcd   : > { %p2355_p2 = por %p2354_p11, %p2353_p8 }
 0xbce   : > { %p2351_p6 = pneg %p2350_p0 }
 0xbd0   : > { %p2356_p3 = pnand %p2355_p2, %p2351_p6 }
 0xbd2   : > { %2359 = shalt.err (!%p2356_p3)
}
 0xbd3   : > { %2202 = dma.vmem_to_hbm [thread:$0]  (%p3140_p4), %s1897_s27, 32, %s3083_s23, %s1883_s24  }
 0xbd4 PF: > { %s1908_s17 = sand.u32 1, %s2388_s10   ;;  %p3141_p9 = scmp.ne.s32.totalorder %s3136_s22, 0 }
 0xbd5   : > { %p3142_p10 = scmp.ge.s32.totalorder %s2400_s12, 2  ;;  %s1909_s19 = scalar_lea.sflag [#allocation6], %s1908_s17 }
 0xbd7   : > { %p2209_p12 = pnand %p3142_p10, %p3141_p9 }
 0xbd9   : > { %p2210_p13 = pneg %p2209_p12 }
 0xbdb   : > { %2383 = dma.done.wait (%p2210_p13), %s1909_s19, 32  }
 0xbdc   : > { %2385 = vsyncadd (%p2210_p13), %s1909_s19, 4294967264  ;;  %p27_p1 = scmp.ge.s32.totalorder %s2487_s15, 4   ;;  %s3143_s10 = smov %s2392_s0 }
 0xbdd   : > { %s3144_s0 = smov %s2396_s11  ;;  %s3145_s11 = smov %s2499_s18 }
 0xbde   : > { %s3146_s12 = smov %s2487_s15  ;;  %29 = sbr.rel (!%p27_p1) target bundleno = 20 (0x14), region = 109 }
 0xbe3   :  { %1914 = vsyncpa [#allocation5], 1 }
 0xbe4   :  { %1916 = vsyncpa [#allocation5 + $0x1], 1 }
 0xbe5   :  { %1917 = vsyncpa [#allocation6], 1 }
 0xbe6   :  { %1919 = vsyncpa [#allocation6 + $0x1], 1 }

</bundles_post_ra>
